<compile_context>
chip_gen: v7x
topology: tpu7x:2x2x1
jax: 0.10.0
libtpu: 0.0.40
codegen_flags: <defaults>
</compile_context>

<pallas_src>
import functools

import jax
import jax.numpy as jnp
from jax.experimental import pallas as pl
from jax.experimental.pallas import tpu as pltpu


# 3x3 tap offsets, fixed ordering shared by kernel and weight packing (t = (dy+1)*3 + (dx+1)).
_OFFSETS = tuple((dy, dx) for dy in (-1, 0, 1) for dx in (-1, 0, 1))


def _wat_layer_kernel(x_ref, wp_ref, w1_ref, b1_ref, w2_ref, b2_ref, m_ref, o_ref, *, W):
    # x_ref  : (Bb, 64, H*W)   x, channels x flat-spatial
    # wp_ref : (Bb, 12, H*W)   watp
    # w1_ref : (9, 32, 12)     conv1 weight per tap, [t, cout, cin]
    # b1_ref : (32, 1)
    # w2_ref : (9, 64, 32)     conv2 weight per tap
    # b2_ref : (64, 1)
    # m_ref  : (4, H*W)        border validity rows: [y-1 ok, y+1 ok, x-1 ok, x+1 ok]
    # o_ref  : (Bb, 64, H*W)
    bb = wp_ref.shape[0]
    hw = wp_ref.shape[-1]

    # Combine the 4 validity rows into the 8 non-centre tap masks (once per grid step).
    m = m_ref[...]
    up, dn, lf, rt = m[0:1], m[1:2], m[2:3], m[3:4]
    tap_mask = {(-1, -1): up * lf, (-1, 0): up, (-1, 1): up * rt,
                (0, -1):  lf,                   (0, 1):  rt,
                (1, -1):  dn * lf, (1, 0):  dn, (1, 1):  dn * rt}

    def conv_taps(src, w_ref):
        # out[:, p] = sum_t w[t] @ src[:, p + dy*W + dx]   (border taps masked to zero)
        # Centre tap (t=4) initializes the accumulator: no roll, no mask.
        acc = jnp.dot(w_ref[4], src, preferred_element_type=jnp.float32)
        for t, (dy, dx) in enumerate(_OFFSETS):
            if dy == 0 and dx == 0:
                continue
            s = dy * W + dx
            # want tap[:, p] = src[:, (p + s) % hw]  ==  roll(src, -s)  (then zeroed at borders)
            tap = pltpu.roll(src, (-s) % hw, axis=1) * tap_mask[(dy, dx)]
            acc = acc + jnp.dot(w_ref[t], tap, preferred_element_type=jnp.float32)
        return acc

    b1 = b1_ref[...]
    b2 = b2_ref[...]
    for b in range(bb):                      # static unrolled loop over images in this block
        wp = wp_ref[b]                                            # (12, hw)
        h = jnp.maximum(conv_taps(wp, w1_ref) + b1, 0.0)          # (32, hw)
        c = conv_taps(h, w2_ref) + b2                             # (64, hw)
        x = x_ref[b]                                              # (64, hw)
        o_ref[b] = jnp.maximum(x * c + c, 0.0)                    # fused epilogue, lane-dense


def _pick_batch_block(B, HW, target_lanes=2048):
    """Images per grid step: amortize per-step overhead for tiny H*W, keep grid >= 2."""
    if B <= 1 or HW >= target_lanes:
        return 1
    want = min(max(B // 2, 1), max(target_lanes // HW, 1))
    for bb in range(want, 0, -1):
        if B % bb == 0:
            return bb
    return 1


def _vmem_limit_bytes(Bb, HW, C_x, C_in, C_mid, C_out):
    io = 4 * Bb * HW * (C_x + C_in + C_out) * 2               # double-buffered I/O blocks
    tmp = 4 * HW * (C_in + 2 * C_mid + 2 * C_out + 16)        # rolled taps / accumulators
    const = 4 * (9 * C_mid * C_in + 9 * C_out * C_mid + C_mid + C_out + 4 * HW) * 2
    need = io + tmp + const + (4 << 20)
    return int(min(max(need, 16 << 20), 100 << 20))


def wat_layer_3_3_forward(x_nchw, watp_nchw, params):
    """x_nchw: (B, 64, H, W), watp_nchw: (B, 12, H, W). Returns (B, 64, H, W)."""
    w1, b1, w2, b2 = params                    # HWIO conv weights, 1-D biases
    B, C_x, H, W = x_nchw.shape
    C_in = watp_nchw.shape[1]
    C_mid, C_out = w1.shape[-1], w2.shape[-1]
    HW = H * W

    # channels x flat-spatial views (contiguous reshapes: no HBM transpose/pad passes)
    x2d = x_nchw.reshape(B, C_x, HW).astype(jnp.float32)
    wp2d = watp_nchw.reshape(B, C_in, HW).astype(jnp.float32)

    # per-tap packed weights: w1p[t, cout, cin] = w1[ky, kx, cin, cout], t = ky*3 + kx
    w1p = jnp.transpose(w1, (0, 1, 3, 2)).reshape(9, C_mid, C_in).astype(jnp.float32)
    w2p = jnp.transpose(w2, (0, 1, 3, 2)).reshape(9, C_out, C_mid).astype(jnp.float32)
    b1c = b1.reshape(C_mid, 1).astype(jnp.float32)
    b2c = b2.reshape(C_out, 1).astype(jnp.float32)

    # compact border-validity rows over the flat spatial axis (implements conv zero padding)
    yy = jnp.repeat(jnp.arange(H, dtype=jnp.int32), W)        # (HW,) row index
    xx = jnp.tile(jnp.arange(W, dtype=jnp.int32), H)          # (HW,) col index
    mask4 = jnp.stack([yy >= 1, yy <= H - 2, xx >= 1, xx <= W - 2]).astype(jnp.float32)

    Bb = _pick_batch_block(B, HW)
    grid = (B // Bb,)
    vmem_limit = _vmem_limit_bytes(Bb, HW, C_x, C_in, C_mid, C_out)

    kernel = functools.partial(_wat_layer_kernel, W=W)

    out2d = pl.pallas_call(
        kernel,
        out_shape=jax.ShapeDtypeStruct((B, C_out, HW), jnp.float32),
        grid_spec=pltpu.PrefetchScalarGridSpec(
            num_scalar_prefetch=0,
            grid=grid,
            in_specs=[
                pl.BlockSpec((Bb, C_x, HW), lambda i: (i, 0, 0)),        # x
                pl.BlockSpec((Bb, C_in, HW), lambda i: (i, 0, 0)),       # watp
                pl.BlockSpec((9, C_mid, C_in), lambda i: (0, 0, 0)),     # w1 per-tap
                pl.BlockSpec((C_mid, 1), lambda i: (0, 0)),              # b1
                pl.BlockSpec((9, C_out, C_mid), lambda i: (0, 0, 0)),    # w2 per-tap
                pl.BlockSpec((C_out, 1), lambda i: (0, 0)),              # b2
                pl.BlockSpec((4, HW), lambda i: (0, 0)),                 # border validity
            ],
            out_specs=pl.BlockSpec((Bb, C_out, HW), lambda i: (i, 0, 0)),
        ),
        compiler_params=pltpu.CompilerParams(
            dimension_semantics=("parallel",),
            vmem_limit_bytes=vmem_limit,
        ),
    )(x2d, wp2d, w1p, b1c, w2p, b2c, mask4)

    return out2d.reshape(B, C_out, H, W)


def make_params(key):
    """Deterministic synthetic parameters matching the module's __init__ shapes (HWIO)."""
    k1, k2, k3, k4 = jax.random.split(key, 4)
    w1 = 0.1 * jax.random.normal(k1, (3, 3, 12, 32), jnp.float32)
    b1 = 0.1 * jax.random.normal(k2, (32,), jnp.float32)
    w2 = 0.1 * jax.random.normal(k3, (3, 3, 32, 64), jnp.float32)
    b2 = 0.1 * jax.random.normal(k4, (64,), jnp.float32)
    return w1, b1, w2, b2


def ref_forward(x_nchw, watp_nchw, params):
    """Pure-JAX reference (matches the PyTorch forward)."""
    w1, b1, w2, b2 = params
    x = jnp.transpose(x_nchw, (0, 2, 3, 1))
    wp = jnp.transpose(watp_nchw, (0, 2, 3, 1))
    dn = ("NHWC", "HWIO", "NHWC")
    h = jax.lax.conv_general_dilated(wp, w1, (1, 1), "SAME",
                                     dimension_numbers=dn) + b1
    h = jnp.maximum(h, 0.0)
    c = jax.lax.conv_general_dilated(h, w2, (1, 1), "SAME",
                                     dimension_numbers=dn) + b2
    out = jnp.maximum(x * c + c, 0.0)
    return jnp.transpose(out, (0, 3, 1, 2))


if __name__ == "__main__":
    key = jax.random.PRNGKey(0)
    kx, kw, kp = jax.random.split(key, 3)

    B, H, W = 2, 16, 16
    x = jax.random.normal(kx, (B, 64, H, W), jnp.float32)      # matches conv output channels
    watp = jax.random.normal(kw, (B, 12, H, W), jnp.float32)   # conv input channels = 12
    params = make_params(kp)

    fwd = jax.jit(wat_layer_3_3_forward)
    out = fwd(x, watp, params)
    out = jax.block_until_ready(out)

    ref = ref_forward(x, watp, params)
    assert out.shape == (B, 64, H, W)
    err = jnp.max(jnp.abs(out - ref))
    assert jnp.allclose(out, ref, rtol=1e-4, atol=1e-4), f"max abs err = {err}"

    print("KERNEL_OK")
</pallas_src>

<mosaic_0001>
module attributes {stable_mosaic.version = 11 : i64} {
  func.func @_wat_layer_kernel(%arg0: i32, %arg1: memref<1x64x256xf32, #tpu.memory_space<vmem>>, %arg2: memref<1x12x256xf32, #tpu.memory_space<vmem>>, %arg3: memref<9x32x12xf32, #tpu.memory_space<vmem>>, %arg4: memref<32x1xf32, #tpu.memory_space<vmem>>, %arg5: memref<9x64x32xf32, #tpu.memory_space<vmem>>, %arg6: memref<64x1xf32, #tpu.memory_space<vmem>>, %arg7: memref<4x256xf32, #tpu.memory_space<vmem>>, %arg8: memref<1x64x256xf32, #tpu.memory_space<vmem>>) attributes {dimension_semantics = [#tpu.dimension_semantics<parallel>], iteration_bounds = array<i64: 2>, scalar_prefetch = 0 : i64, scratch_operands = 0 : i64, tpu.core_type = #tpu.core_type<tc>, window_params = [{transform_indices = @transform_0, window_bounds = array<i64: 1, 64, 256>}, {transform_indices = @transform_1, window_bounds = array<i64: 1, 12, 256>}, {pipeline_mode = #tpu.pipeline_mode<synchronous>, transform_indices = @transform_2, window_bounds = array<i64: 9, 32, 12>}, {pipeline_mode = #tpu.pipeline_mode<synchronous>, transform_indices = @transform_3, window_bounds = array<i64: 32, 1>}, {pipeline_mode = #tpu.pipeline_mode<synchronous>, transform_indices = @transform_4, window_bounds = array<i64: 9, 64, 32>}, {pipeline_mode = #tpu.pipeline_mode<synchronous>, transform_indices = @transform_5, window_bounds = array<i64: 64, 1>}, {pipeline_mode = #tpu.pipeline_mode<synchronous>, transform_indices = @transform_6, window_bounds = array<i64: 4, 256>}, {transform_indices = @transform_7, window_bounds = array<i64: 1, 64, 256>}]} {
    %c0 = arith.constant 0 : index
    %c0_0 = arith.constant 0 : index
    %0 = vector.load %arg7[%c0, %c0_0] : memref<4x256xf32, #tpu.memory_space<vmem>>, vector<4x256xf32>
    %1 = vector.extract_strided_slice %0 {offsets = [0, 0], sizes = [1, 256], strides = [1, 1]} : vector<4x256xf32> to vector<1x256xf32>
    %2 = vector.extract_strided_slice %0 {offsets = [1, 0], sizes = [1, 256], strides = [1, 1]} : vector<4x256xf32> to vector<1x256xf32>
    %3 = vector.extract_strided_slice %0 {offsets = [2, 0], sizes = [1, 256], strides = [1, 1]} : vector<4x256xf32> to vector<1x256xf32>
    %4 = vector.extract_strided_slice %0 {offsets = [3, 0], sizes = [1, 256], strides = [1, 1]} : vector<4x256xf32> to vector<1x256xf32>
    %5 = arith.mulf %1, %3 : vector<1x256xf32>
    %6 = arith.mulf %1, %4 : vector<1x256xf32>
    %7 = arith.mulf %2, %3 : vector<1x256xf32>
    %8 = arith.mulf %2, %4 : vector<1x256xf32>
    %c0_1 = arith.constant 0 : index
    %c0_2 = arith.constant 0 : index
    %9 = vector.load %arg4[%c0_1, %c0_2] : memref<32x1xf32, #tpu.memory_space<vmem>>, vector<32x1xf32>
    %c0_3 = arith.constant 0 : index
    %c0_4 = arith.constant 0 : index
    %10 = vector.load %arg6[%c0_3, %c0_4] : memref<64x1xf32, #tpu.memory_space<vmem>>, vector<64x1xf32>
    %c0_5 = arith.constant 0 : index
    %c0_6 = arith.constant 0 : index
    %c0_7 = arith.constant 0 : index
    %11 = vector.load %arg2[%c0_5, %c0_6, %c0_7] : memref<1x12x256xf32, #tpu.memory_space<vmem>>, vector<1x12x256xf32>
    %12 = vector.shape_cast %11 : vector<1x12x256xf32> to vector<12x256xf32>
    %c4 = arith.constant 4 : index
    %c0_8 = arith.constant 0 : index
    %c0_9 = arith.constant 0 : index
    %13 = vector.load %arg3[%c4, %c0_8, %c0_9] : memref<9x32x12xf32, #tpu.memory_space<vmem>>, vector<1x32x12xf32>
    %14 = vector.shape_cast %13 : vector<1x32x12xf32> to vector<32x12xf32>
    %cst = arith.constant dense<0.000000e+00> : vector<32x256xf32>
    %15 = tpu.matmul %14, %12, %cst {dimension_numbers = #tpu.dot_dimension_numbers<[1], [0], [0], [1], [0, 0, 1, 1], [], []>} : vector<32x12xf32>, vector<12x256xf32>, vector<32x256xf32> -> vector<32x256xf32>
    %c17_i32 = arith.constant 17 : i32
    %16 = tpu.dynamic_rotate %12 by %c17_i32 dim 1 : vector<12x256xf32>, i32 -> vector<12x256xf32>
    %17 = vector.broadcast %5 : vector<1x256xf32> to vector<12x256xf32>
    %18 = arith.mulf %16, %17 : vector<12x256xf32>
    %c0_10 = arith.constant 0 : index
    %c0_11 = arith.constant 0 : index
    %c0_12 = arith.constant 0 : index
    %19 = vector.load %arg3[%c0_10, %c0_11, %c0_12] : memref<9x32x12xf32, #tpu.memory_space<vmem>>, vector<1x32x12xf32>
    %20 = vector.shape_cast %19 : vector<1x32x12xf32> to vector<32x12xf32>
    %cst_13 = arith.constant dense<0.000000e+00> : vector<32x256xf32>
    %21 = tpu.matmul %20, %18, %cst_13 {dimension_numbers = #tpu.dot_dimension_numbers<[1], [0], [0], [1], [0, 0, 1, 1], [], []>} : vector<32x12xf32>, vector<12x256xf32>, vector<32x256xf32> -> vector<32x256xf32>
    %22 = arith.addf %15, %21 : vector<32x256xf32>
    %c16_i32 = arith.constant 16 : i32
    %23 = tpu.dynamic_rotate %12 by %c16_i32 dim 1 : vector<12x256xf32>, i32 -> vector<12x256xf32>
    %24 = vector.broadcast %1 : vector<1x256xf32> to vector<12x256xf32>
    %25 = arith.mulf %23, %24 : vector<12x256xf32>
    %c1 = arith.constant 1 : index
    %c0_14 = arith.constant 0 : index
    %c0_15 = arith.constant 0 : index
    %26 = vector.load %arg3[%c1, %c0_14, %c0_15] : memref<9x32x12xf32, #tpu.memory_space<vmem>>, vector<1x32x12xf32>
    %27 = vector.shape_cast %26 : vector<1x32x12xf32> to vector<32x12xf32>
    %cst_16 = arith.constant dense<0.000000e+00> : vector<32x256xf32>
    %28 = tpu.matmul %27, %25, %cst_16 {dimension_numbers = #tpu.dot_dimension_numbers<[1], [0], [0], [1], [0, 0, 1, 1], [], []>} : vector<32x12xf32>, vector<12x256xf32>, vector<32x256xf32> -> vector<32x256xf32>
    %29 = arith.addf %22, %28 : vector<32x256xf32>
    %c15_i32 = arith.constant 15 : i32
    %30 = tpu.dynamic_rotate %12 by %c15_i32 dim 1 : vector<12x256xf32>, i32 -> vector<12x256xf32>
    %31 = vector.broadcast %6 : vector<1x256xf32> to vector<12x256xf32>
    %32 = arith.mulf %30, %31 : vector<12x256xf32>
    %c2 = arith.constant 2 : index
    %c0_17 = arith.constant 0 : index
    %c0_18 = arith.constant 0 : index
    %33 = vector.load %arg3[%c2, %c0_17, %c0_18] : memref<9x32x12xf32, #tpu.memory_space<vmem>>, vector<1x32x12xf32>
    %34 = vector.shape_cast %33 : vector<1x32x12xf32> to vector<32x12xf32>
    %cst_19 = arith.constant dense<0.000000e+00> : vector<32x256xf32>
    %35 = tpu.matmul %34, %32, %cst_19 {dimension_numbers = #tpu.dot_dimension_numbers<[1], [0], [0], [1], [0, 0, 1, 1], [], []>} : vector<32x12xf32>, vector<12x256xf32>, vector<32x256xf32> -> vector<32x256xf32>
    %36 = arith.addf %29, %35 : vector<32x256xf32>
    %c1_i32 = arith.constant 1 : i32
    %37 = tpu.dynamic_rotate %12 by %c1_i32 dim 1 : vector<12x256xf32>, i32 -> vector<12x256xf32>
    %38 = vector.broadcast %3 : vector<1x256xf32> to vector<12x256xf32>
    %39 = arith.mulf %37, %38 : vector<12x256xf32>
    %c3 = arith.constant 3 : index
    %c0_20 = arith.constant 0 : index
    %c0_21 = arith.constant 0 : index
    %40 = vector.load %arg3[%c3, %c0_20, %c0_21] : memref<9x32x12xf32, #tpu.memory_space<vmem>>, vector<1x32x12xf32>
    %41 = vector.shape_cast %40 : vector<1x32x12xf32> to vector<32x12xf32>
    %cst_22 = arith.constant dense<0.000000e+00> : vector<32x256xf32>
    %42 = tpu.matmul %41, %39, %cst_22 {dimension_numbers = #tpu.dot_dimension_numbers<[1], [0], [0], [1], [0, 0, 1, 1], [], []>} : vector<32x12xf32>, vector<12x256xf32>, vector<32x256xf32> -> vector<32x256xf32>
    %43 = arith.addf %36, %42 : vector<32x256xf32>
    %c255_i32 = arith.constant 255 : i32
    %44 = tpu.dynamic_rotate %12 by %c255_i32 dim 1 : vector<12x256xf32>, i32 -> vector<12x256xf32>
    %45 = vector.broadcast %4 : vector<1x256xf32> to vector<12x256xf32>
    %46 = arith.mulf %44, %45 : vector<12x256xf32>
    %c5 = arith.constant 5 : index
    %c0_23 = arith.constant 0 : index
    %c0_24 = arith.constant 0 : index
    %47 = vector.load %arg3[%c5, %c0_23, %c0_24] : memref<9x32x12xf32, #tpu.memory_space<vmem>>, vector<1x32x12xf32>
    %48 = vector.shape_cast %47 : vector<1x32x12xf32> to vector<32x12xf32>
    %cst_25 = arith.constant dense<0.000000e+00> : vector<32x256xf32>
    %49 = tpu.matmul %48, %46, %cst_25 {dimension_numbers = #tpu.dot_dimension_numbers<[1], [0], [0], [1], [0, 0, 1, 1], [], []>} : vector<32x12xf32>, vector<12x256xf32>, vector<32x256xf32> -> vector<32x256xf32>
    %50 = arith.addf %43, %49 : vector<32x256xf32>
    %c241_i32 = arith.constant 241 : i32
    %51 = tpu.dynamic_rotate %12 by %c241_i32 dim 1 : vector<12x256xf32>, i32 -> vector<12x256xf32>
    %52 = vector.broadcast %7 : vector<1x256xf32> to vector<12x256xf32>
    %53 = arith.mulf %51, %52 : vector<12x256xf32>
    %c6 = arith.constant 6 : index
    %c0_26 = arith.constant 0 : index
    %c0_27 = arith.constant 0 : index
    %54 = vector.load %arg3[%c6, %c0_26, %c0_27] : memref<9x32x12xf32, #tpu.memory_space<vmem>>, vector<1x32x12xf32>
    %55 = vector.shape_cast %54 : vector<1x32x12xf32> to vector<32x12xf32>
    %cst_28 = arith.constant dense<0.000000e+00> : vector<32x256xf32>
    %56 = tpu.matmul %55, %53, %cst_28 {dimension_numbers = #tpu.dot_dimension_numbers<[1], [0], [0], [1], [0, 0, 1, 1], [], []>} : vector<32x12xf32>, vector<12x256xf32>, vector<32x256xf32> -> vector<32x256xf32>
    %57 = arith.addf %50, %56 : vector<32x256xf32>
    %c240_i32 = arith.constant 240 : i32
    %58 = tpu.dynamic_rotate %12 by %c240_i32 dim 1 : vector<12x256xf32>, i32 -> vector<12x256xf32>
    %59 = vector.broadcast %2 : vector<1x256xf32> to vector<12x256xf32>
    %60 = arith.mulf %58, %59 : vector<12x256xf32>
    %c7 = arith.constant 7 : index
    %c0_29 = arith.constant 0 : index
    %c0_30 = arith.constant 0 : index
    %61 = vector.load %arg3[%c7, %c0_29, %c0_30] : memref<9x32x12xf32, #tpu.memory_space<vmem>>, vector<1x32x12xf32>
    %62 = vector.shape_cast %61 : vector<1x32x12xf32> to vector<32x12xf32>
    %cst_31 = arith.constant dense<0.000000e+00> : vector<32x256xf32>
    %63 = tpu.matmul %62, %60, %cst_31 {dimension_numbers = #tpu.dot_dimension_numbers<[1], [0], [0], [1], [0, 0, 1, 1], [], []>} : vector<32x12xf32>, vector<12x256xf32>, vector<32x256xf32> -> vector<32x256xf32>
    %64 = arith.addf %57, %63 : vector<32x256xf32>
    %c239_i32 = arith.constant 239 : i32
    %65 = tpu.dynamic_rotate %12 by %c239_i32 dim 1 : vector<12x256xf32>, i32 -> vector<12x256xf32>
    %66 = vector.broadcast %8 : vector<1x256xf32> to vector<12x256xf32>
    %67 = arith.mulf %65, %66 : vector<12x256xf32>
    %c8 = arith.constant 8 : index
    %c0_32 = arith.constant 0 : index
    %c0_33 = arith.constant 0 : index
    %68 = vector.load %arg3[%c8, %c0_32, %c0_33] : memref<9x32x12xf32, #tpu.memory_space<vmem>>, vector<1x32x12xf32>
    %69 = vector.shape_cast %68 : vector<1x32x12xf32> to vector<32x12xf32>
    %cst_34 = arith.constant dense<0.000000e+00> : vector<32x256xf32>
    %70 = tpu.matmul %69, %67, %cst_34 {dimension_numbers = #tpu.dot_dimension_numbers<[1], [0], [0], [1], [0, 0, 1, 1], [], []>} : vector<32x12xf32>, vector<12x256xf32>, vector<32x256xf32> -> vector<32x256xf32>
    %71 = arith.addf %64, %70 : vector<32x256xf32>
    %72 = vector.broadcast %9 : vector<32x1xf32> to vector<32x256xf32>
    %73 = arith.addf %71, %72 : vector<32x256xf32>
    %cst_35 = arith.constant 0.000000e+00 : f32
    %74 = vector.broadcast %cst_35 : f32 to vector<32x256xf32>
    %75 = arith.maximumf %73, %74 : vector<32x256xf32>
    %c4_36 = arith.constant 4 : index
    %c0_37 = arith.constant 0 : index
    %c0_38 = arith.constant 0 : index
    %76 = vector.load %arg5[%c4_36, %c0_37, %c0_38] : memref<9x64x32xf32, #tpu.memory_space<vmem>>, vector<1x64x32xf32>
    %77 = vector.shape_cast %76 : vector<1x64x32xf32> to vector<64x32xf32>
    %cst_39 = arith.constant dense<0.000000e+00> : vector<64x256xf32>
    %78 = tpu.matmul %77, %75, %cst_39 {dimension_numbers = #tpu.dot_dimension_numbers<[1], [0], [0], [1], [0, 0, 1, 1], [], []>} : vector<64x32xf32>, vector<32x256xf32>, vector<64x256xf32> -> vector<64x256xf32>
    %c17_i32_40 = arith.constant 17 : i32
    %79 = tpu.dynamic_rotate %75 by %c17_i32_40 dim 1 : vector<32x256xf32>, i32 -> vector<32x256xf32>
    %80 = vector.broadcast %5 : vector<1x256xf32> to vector<32x256xf32>
    %81 = arith.mulf %79, %80 : vector<32x256xf32>
    %c0_41 = arith.constant 0 : index
    %c0_42 = arith.constant 0 : index
    %c0_43 = arith.constant 0 : index
    %82 = vector.load %arg5[%c0_41, %c0_42, %c0_43] : memref<9x64x32xf32, #tpu.memory_space<vmem>>, vector<1x64x32xf32>
    %83 = vector.shape_cast %82 : vector<1x64x32xf32> to vector<64x32xf32>
    %cst_44 = arith.constant dense<0.000000e+00> : vector<64x256xf32>
    %84 = tpu.matmul %83, %81, %cst_44 {dimension_numbers = #tpu.dot_dimension_numbers<[1], [0], [0], [1], [0, 0, 1, 1], [], []>} : vector<64x32xf32>, vector<32x256xf32>, vector<64x256xf32> -> vector<64x256xf32>
    %85 = arith.addf %78, %84 : vector<64x256xf32>
    %c16_i32_45 = arith.constant 16 : i32
    %86 = tpu.dynamic_rotate %75 by %c16_i32_45 dim 1 : vector<32x256xf32>, i32 -> vector<32x256xf32>
    %87 = vector.broadcast %1 : vector<1x256xf32> to vector<32x256xf32>
    %88 = arith.mulf %86, %87 : vector<32x256xf32>
    %c1_46 = arith.constant 1 : index
    %c0_47 = arith.constant 0 : index
    %c0_48 = arith.constant 0 : index
    %89 = vector.load %arg5[%c1_46, %c0_47, %c0_48] : memref<9x64x32xf32, #tpu.memory_space<vmem>>, vector<1x64x32xf32>
    %90 = vector.shape_cast %89 : vector<1x64x32xf32> to vector<64x32xf32>
    %cst_49 = arith.constant dense<0.000000e+00> : vector<64x256xf32>
    %91 = tpu.matmul %90, %88, %cst_49 {dimension_numbers = #tpu.dot_dimension_numbers<[1], [0], [0], [1], [0, 0, 1, 1], [], []>} : vector<64x32xf32>, vector<32x256xf32>, vector<64x256xf32> -> vector<64x256xf32>
    %92 = arith.addf %85, %91 : vector<64x256xf32>
    %c15_i32_50 = arith.constant 15 : i32
    %93 = tpu.dynamic_rotate %75 by %c15_i32_50 dim 1 : vector<32x256xf32>, i32 -> vector<32x256xf32>
    %94 = vector.broadcast %6 : vector<1x256xf32> to vector<32x256xf32>
    %95 = arith.mulf %93, %94 : vector<32x256xf32>
    %c2_51 = arith.constant 2 : index
    %c0_52 = arith.constant 0 : index
    %c0_53 = arith.constant 0 : index
    %96 = vector.load %arg5[%c2_51, %c0_52, %c0_53] : memref<9x64x32xf32, #tpu.memory_space<vmem>>, vector<1x64x32xf32>
    %97 = vector.shape_cast %96 : vector<1x64x32xf32> to vector<64x32xf32>
    %cst_54 = arith.constant dense<0.000000e+00> : vector<64x256xf32>
    %98 = tpu.matmul %97, %95, %cst_54 {dimension_numbers = #tpu.dot_dimension_numbers<[1], [0], [0], [1], [0, 0, 1, 1], [], []>} : vector<64x32xf32>, vector<32x256xf32>, vector<64x256xf32> -> vector<64x256xf32>
    %99 = arith.addf %92, %98 : vector<64x256xf32>
    %c1_i32_55 = arith.constant 1 : i32
    %100 = tpu.dynamic_rotate %75 by %c1_i32_55 dim 1 : vector<32x256xf32>, i32 -> vector<32x256xf32>
    %101 = vector.broadcast %3 : vector<1x256xf32> to vector<32x256xf32>
    %102 = arith.mulf %100, %101 : vector<32x256xf32>
    %c3_56 = arith.constant 3 : index
    %c0_57 = arith.constant 0 : index
    %c0_58 = arith.constant 0 : index
    %103 = vector.load %arg5[%c3_56, %c0_57, %c0_58] : memref<9x64x32xf32, #tpu.memory_space<vmem>>, vector<1x64x32xf32>
    %104 = vector.shape_cast %103 : vector<1x64x32xf32> to vector<64x32xf32>
    %cst_59 = arith.constant dense<0.000000e+00> : vector<64x256xf32>
    %105 = tpu.matmul %104, %102, %cst_59 {dimension_numbers = #tpu.dot_dimension_numbers<[1], [0], [0], [1], [0, 0, 1, 1], [], []>} : vector<64x32xf32>, vector<32x256xf32>, vector<64x256xf32> -> vector<64x256xf32>
    %106 = arith.addf %99, %105 : vector<64x256xf32>
    %c255_i32_60 = arith.constant 255 : i32
    %107 = tpu.dynamic_rotate %75 by %c255_i32_60 dim 1 : vector<32x256xf32>, i32 -> vector<32x256xf32>
    %108 = vector.broadcast %4 : vector<1x256xf32> to vector<32x256xf32>
    %109 = arith.mulf %107, %108 : vector<32x256xf32>
    %c5_61 = arith.constant 5 : index
    %c0_62 = arith.constant 0 : index
    %c0_63 = arith.constant 0 : index
    %110 = vector.load %arg5[%c5_61, %c0_62, %c0_63] : memref<9x64x32xf32, #tpu.memory_space<vmem>>, vector<1x64x32xf32>
    %111 = vector.shape_cast %110 : vector<1x64x32xf32> to vector<64x32xf32>
    %cst_64 = arith.constant dense<0.000000e+00> : vector<64x256xf32>
    %112 = tpu.matmul %111, %109, %cst_64 {dimension_numbers = #tpu.dot_dimension_numbers<[1], [0], [0], [1], [0, 0, 1, 1], [], []>} : vector<64x32xf32>, vector<32x256xf32>, vector<64x256xf32> -> vector<64x256xf32>
    %113 = arith.addf %106, %112 : vector<64x256xf32>
    %c241_i32_65 = arith.constant 241 : i32
    %114 = tpu.dynamic_rotate %75 by %c241_i32_65 dim 1 : vector<32x256xf32>, i32 -> vector<32x256xf32>
    %115 = vector.broadcast %7 : vector<1x256xf32> to vector<32x256xf32>
    %116 = arith.mulf %114, %115 : vector<32x256xf32>
    %c6_66 = arith.constant 6 : index
    %c0_67 = arith.constant 0 : index
    %c0_68 = arith.constant 0 : index
    %117 = vector.load %arg5[%c6_66, %c0_67, %c0_68] : memref<9x64x32xf32, #tpu.memory_space<vmem>>, vector<1x64x32xf32>
    %118 = vector.shape_cast %117 : vector<1x64x32xf32> to vector<64x32xf32>
    %cst_69 = arith.constant dense<0.000000e+00> : vector<64x256xf32>
    %119 = tpu.matmul %118, %116, %cst_69 {dimension_numbers = #tpu.dot_dimension_numbers<[1], [0], [0], [1], [0, 0, 1, 1], [], []>} : vector<64x32xf32>, vector<32x256xf32>, vector<64x256xf32> -> vector<64x256xf32>
    %120 = arith.addf %113, %119 : vector<64x256xf32>
    %c240_i32_70 = arith.constant 240 : i32
    %121 = tpu.dynamic_rotate %75 by %c240_i32_70 dim 1 : vector<32x256xf32>, i32 -> vector<32x256xf32>
    %122 = vector.broadcast %2 : vector<1x256xf32> to vector<32x256xf32>
    %123 = arith.mulf %121, %122 : vector<32x256xf32>
    %c7_71 = arith.constant 7 : index
    %c0_72 = arith.constant 0 : index
    %c0_73 = arith.constant 0 : index
    %124 = vector.load %arg5[%c7_71, %c0_72, %c0_73] : memref<9x64x32xf32, #tpu.memory_space<vmem>>, vector<1x64x32xf32>
    %125 = vector.shape_cast %124 : vector<1x64x32xf32> to vector<64x32xf32>
    %cst_74 = arith.constant dense<0.000000e+00> : vector<64x256xf32>
    %126 = tpu.matmul %125, %123, %cst_74 {dimension_numbers = #tpu.dot_dimension_numbers<[1], [0], [0], [1], [0, 0, 1, 1], [], []>} : vector<64x32xf32>, vector<32x256xf32>, vector<64x256xf32> -> vector<64x256xf32>
    %127 = arith.addf %120, %126 : vector<64x256xf32>
    %c239_i32_75 = arith.constant 239 : i32
    %128 = tpu.dynamic_rotate %75 by %c239_i32_75 dim 1 : vector<32x256xf32>, i32 -> vector<32x256xf32>
    %129 = vector.broadcast %8 : vector<1x256xf32> to vector<32x256xf32>
    %130 = arith.mulf %128, %129 : vector<32x256xf32>
    %c8_76 = arith.constant 8 : index
    %c0_77 = arith.constant 0 : index
    %c0_78 = arith.constant 0 : index
    %131 = vector.load %arg5[%c8_76, %c0_77, %c0_78] : memref<9x64x32xf32, #tpu.memory_space<vmem>>, vector<1x64x32xf32>
    %132 = vector.shape_cast %131 : vector<1x64x32xf32> to vector<64x32xf32>
    %cst_79 = arith.constant dense<0.000000e+00> : vector<64x256xf32>
    %133 = tpu.matmul %132, %130, %cst_79 {dimension_numbers = #tpu.dot_dimension_numbers<[1], [0], [0], [1], [0, 0, 1, 1], [], []>} : vector<64x32xf32>, vector<32x256xf32>, vector<64x256xf32> -> vector<64x256xf32>
    %134 = arith.addf %127, %133 : vector<64x256xf32>
    %135 = vector.broadcast %10 : vector<64x1xf32> to vector<64x256xf32>
    %136 = arith.addf %134, %135 : vector<64x256xf32>
    %c0_80 = arith.constant 0 : index
    %c0_81 = arith.constant 0 : index
    %c0_82 = arith.constant 0 : index
    %137 = vector.load %arg1[%c0_80, %c0_81, %c0_82] : memref<1x64x256xf32, #tpu.memory_space<vmem>>, vector<1x64x256xf32>
    %138 = vector.shape_cast %137 : vector<1x64x256xf32> to vector<64x256xf32>
    %139 = arith.mulf %138, %136 : vector<64x256xf32>
    %140 = arith.addf %139, %136 : vector<64x256xf32>
    %cst_83 = arith.constant 0.000000e+00 : f32
    %141 = vector.broadcast %cst_83 : f32 to vector<64x256xf32>
    %142 = arith.maximumf %140, %141 : vector<64x256xf32>
    %c0_84 = arith.constant 0 : index
    %c0_85 = arith.constant 0 : index
    %c0_86 = arith.constant 0 : index
    %143 = vector.load %arg8[%c0_84, %c0_85, %c0_86] : memref<1x64x256xf32, #tpu.memory_space<vmem>>, vector<1x64x256xf32>
    %144 = vector.shape_cast %143 : vector<1x64x256xf32> to vector<64x256xf32>
    %145 = vector.shape_cast %142 : vector<64x256xf32> to vector<1x64x256xf32>
    tpu.vector_store %arg8[%c0_84, %c0_85, %c0_86], %145 {strides = array<i32>} : memref<1x64x256xf32, #tpu.memory_space<vmem>>, vector<1x64x256xf32>,
    return
  }
  func.func @transform_0(%arg0: i32) -> (i32, i32, i32) {
    %c0_i32 = arith.constant 0 : i32
    %c0_i32_0 = arith.constant 0 : i32
    %c0_i32_1 = arith.constant 0 : i32
    return %arg0, %c0_i32, %c0_i32_0 : i32, i32, i32
  }
  func.func @transform_1(%arg0: i32) -> (i32, i32, i32) {
    %c0_i32 = arith.constant 0 : i32
    %c0_i32_0 = arith.constant 0 : i32
    %c0_i32_1 = arith.constant 0 : i32
    return %arg0, %c0_i32, %c0_i32_0 : i32, i32, i32
  }
  func.func @transform_2(%arg0: i32) -> (i32, i32, i32) {
    %c0_i32 = arith.constant 0 : i32
    %c0_i32_0 = arith.constant 0 : i32
    %c0_i32_1 = arith.constant 0 : i32
    %c0_i32_2 = arith.constant 0 : i32
    return %c0_i32, %c0_i32_0, %c0_i32_1 : i32, i32, i32
  }
  func.func @transform_3(%arg0: i32) -> (i32, i32) {
    %c0_i32 = arith.constant 0 : i32
    %c0_i32_0 = arith.constant 0 : i32
    %c0_i32_1 = arith.constant 0 : i32
    return %c0_i32, %c0_i32_0 : i32, i32
  }
  func.func @transform_4(%arg0: i32) -> (i32, i32, i32) {
    %c0_i32 = arith.constant 0 : i32
    %c0_i32_0 = arith.constant 0 : i32
    %c0_i32_1 = arith.constant 0 : i32
    %c0_i32_2 = arith.constant 0 : i32
    return %c0_i32, %c0_i32_0, %c0_i32_1 : i32, i32, i32
  }
  func.func @transform_5(%arg0: i32) -> (i32, i32) {
    %c0_i32 = arith.constant 0 : i32
    %c0_i32_0 = arith.constant 0 : i32
    %c0_i32_1 = arith.constant 0 : i32
    return %c0_i32, %c0_i32_0 : i32, i32
  }
  func.func @transform_6(%arg0: i32) -> (i32, i32) {
    %c0_i32 = arith.constant 0 : i32
    %c0_i32_0 = arith.constant 0 : i32
    %c0_i32_1 = arith.constant 0 : i32
    return %c0_i32, %c0_i32_0 : i32, i32
  }
  func.func @transform_7(%arg0: i32) -> (i32, i32, i32) {
    %c0_i32 = arith.constant 0 : i32
    %c0_i32_0 = arith.constant 0 : i32
    %c0_i32_1 = arith.constant 0 : i32
    return %arg0, %c0_i32, %c0_i32_0 : i32, i32, i32
  }
}

</mosaic_0001>

<bundles_post_ra>
// kernel: wat_layer_3_3_forward.1
= control target key start
LH: loop header
LB: loop body
LE: loop exit
PB: predicated region body
PF: predicated region fallthrough
CT: control target
= control target key end

     0   :  { %s4243_s24 = smov 0   ;;  %s5656_s0 = inlined_call_operand.vmem [shape: f32[2,64,256], index: 0, kind: input, shape index: {}]   ;;  %s5657_s1 = inlined_call_operand.vmem [shape: f32[2,12,256], index: 1, kind: input, shape index: {}]   ;;  %s5658_s2 = inlined_call_operand.vmem [shape: f32[9,32,12], index: 2, kind: input, shape index: {}]   ;;  %s5659_s3 = inlined_call_operand.vmem [shape: f32[32,1], index: 3, kind: input, shape index: {}]   ;;  %s5660_s4 = inlined_call_operand.vmem [shape: f32[9,64,32], index: 4, kind: input, shape index: {}]   ;;  %s5661_s5 = inlined_call_operand.vmem [shape: f32[64,1], index: 5, kind: input, shape index: {}]   ;;  %s5662_s6 = inlined_call_operand.vmem [shape: f32[4,256], index: 6, kind: input, shape index: {}]   ;;  %s5663_s7 = inlined_call_operand.vmem [shape: f32[2,64,256], index: 7, kind: output, shape index: {}]  }
   0x1 LB: > { %s3600_s25 = sadd.s32 4294967295, %s4190_s24   ;;  %p3604_p0 = scmp.ge.s32.totalorder %s4190_s24, 1  ;;  %s4190_s24 = sphi %s4243_s24, %s17_s24  }
   0x2   : > { %p247_p1 = scmp.lt.s32.totalorder %s4190_s24, 3 }
   0x4   : > { %p248_p2 = pnand %p3604_p0, %p247_p1 }
   0x5   : > { %p284_p3 = scmp.lt.s32.totalorder (!%p248_p2), %s3600_s25, 1  ;;  %v4192_v0 = vmov (!%p248_p2), 0.0   ;;  %s4193_s30 = smov (!%p248_p2), 17   ;;  %v342_v7 = vlaneseq (!%p248_p2)  ;;  %v4338_v8 = vld [vmem:[%s5662_s6] sm:$0xff] (!%p248_p2)  ;;  %vm389_vm1 = vcmask (!%p248_p2), 1043456   ;;  %vm4201_vm2 = vmmov (!%p248_p2), 1  }
   0x6   : > { %251 = sbr.rel (%p248_p2) target bundleno = 1065 (0x429), region = 48  ;;  %460 = vmatprep.mubr.f32.mxu0 (!%p248_p2), %v4192_v0  ;;  %2180 = vmatprep.mubr.f32.mxu1 (!%p248_p2), %v4192_v0  ;;  %s4194_s8 = smov (!%p248_p2), 16   ;;  %v3611_v9 = vrot.slane (!%p248_p2), %v4338_v8, 10  ;;  %vm4375_vm3 = vmpackc.low (!%p248_p2), %vm389_vm1, %vm4201_vm2  ;;  %v3612_v37 = vrot.slane (!%p248_p2), %v4338_v8, 11  ;;  %v372_v39 = vld [vmem:[%s5658_s2] sm:$0xff] (!%p248_p2)  ;;  %vm376_vm5 = vcmask (!%p248_p2), 97280  }
   0x7   : > { %s4195_s9 = smov (!%p248_p2), 15   ;;  %s4196_s10 = smov (!%p248_p2), 1   ;;  %v4341_v10 = vshrl.u32 (!%p248_p2), %v342_v7, 7  ;;  %v4350_v14 = vand.u32 (!%p248_p2), 127, %v342_v7  ;;  %v373_v47 = vld [vmem:[%s5658_s2 + $0x8] sm:$0xff] (!%p248_p2)  ;;  %v374_v53 = vld [vmem:[%s5658_s2 + $0x10] sm:$0xff] (!%p248_p2) }
   0x8   : > { %s4197_s11 = smov (!%p248_p2), 127   ;;  %s4198_s12 = smov (!%p248_p2), 113   ;;  %v4344_v11 = vmul.f32 (!%p248_p2), %v3611_v9, %v4338_v8  ;;  %v4397_v42 = vmul.f32 (!%p248_p2), %v3612_v37, %v4338_v8  ;;  %v3614_v7 = vld [vmem:[%s5658_s2 + $0x80] sm:$0xff] (!%p248_p2)  ;;  %v4202_v9 = vmov (!%p248_p2), 0   ;;  %v3617_v37 = vld [vmem:[%s5658_s2 + $0x98] sm:$0xff] (!%p248_p2)  ;;  %vm1764_vm12 = vcmask (!%p248_p2), 261120  }
   0x9   : > { %s4199_s13 = smov (!%p248_p2), 112   ;;  %s4200_s14 = smov (!%p248_p2), 111   ;;  %v4347_v12 = vsub.s32 (!%p248_p2), 0, %v4341_v10  ;;  %v356_v13 = vsub.s32 (!%p248_p2), 4, %v4341_v10  ;;  %vm344_vm0 = vcmp.lt.s32.totalorder (!%p248_p2), %v4350_v14, 17  ;;  %vm600_vm4 = vcmp.lt.s32.totalorder (!%p248_p2), %v4350_v14, 16  ;;  %4183 = vset.pattern.permute.xlu1 (!%p248_p2), %v4202_v9  ;;  %4182 = vset.pattern.permute.xlu0 (!%p248_p2), %v4202_v9 }
   0xa   : > { %vm755_vm6 = vcmp.lt.s32.totalorder (!%p248_p2), %v4350_v14, 15  ;;  %vm911_vm7 = vcmp.lt.s32.totalorder (!%p248_p2), %v4350_v14, 1  ;;  %vm1066_vm8 = vcmp.lt.s32.totalorder (!%p248_p2), %v4350_v14, 127  ;;  %vm1221_vm9 = vcmp.lt.s32.totalorder (!%p248_p2), %v4350_v14, 113  ;;  %v3683_v32 = vld [vmem:[%s5658_s2 + $0xf8] sm:$0xff] (!%p248_p2) }
   0xb   : > { %v353_v15 = vrot.slane (!%p248_p2), %v4344_v11, %v4347_v12  ;;  %v357_v16 = vrot.slane (!%p248_p2), %v4344_v11, %v356_v13  ;;  %v612_v27 = vrot.slane (!%p248_p2), %v4338_v8, %v356_v13  ;;  %v608_v48 = vrot.slane (!%p248_p2), %v4338_v8, %v4347_v12 }
   0xc   : > { %v768_v52 = vrot.slane (!%p248_p2), %v4397_v42, %v356_v13  ;;  %vm1377_vm10 = vcmp.lt.s32.totalorder (!%p248_p2), %v4350_v14, 112  ;;  %vm1532_vm11 = vcmp.lt.s32.totalorder (!%p248_p2), %v4350_v14, 111  ;;  %v3725_v14 = vld [vmem:[%s5660_s4 + $0x48] sm:$0xff] (!%p248_p2) }
   0xd   : > { %s5667_s25 = smov (!%p284_p3, %s3600_s25), 1  ;;  %v4357_v19 = vrot.slane %v353_v15, %v4347_v12  ;;  %v4360_v20 = vrot.slane %v357_v16, %v4347_v12  ;;  %v4384_v38 = vrot.slane %v612_v27, %v4347_v12  ;;  %v4427_v54 = vrot.slane %v608_v48, %v4347_v12 }
   0xe   : > { %s3839_s26 = sshll.u32 %s5667_s25, 5  ;;  %v4434_v57 = vrot.slane %v768_v52, %v4347_v12 }
   0xf   : > { %s293_s29 = scalar_lea.vmem %s5657_s1, %s3839_s26  ;;  %s3838_s26 = sshll.u32 %s5667_s25, 7 }
  0x10   : > { %v4259_v1 = vld [vmem:[%s293_s29 + $0x8] sm:$0xff]  ;;  %v4261_v2 = vld [vmem:[%s293_s29] sm:$0xff]  ;;  %v4267_v3 = vld [vmem:[%s293_s29 + $0x18] sm:$0xf]  ;;  %s5614_s16 = scalar_lea.vmem %s5663_s7, %s3838_s26 }
  0x11   : > { %338 = vrot.lane.b32.xlu1 %v4259_v1, %s4193_s30  ;;  %334 = vrot.lane.b32.xlu0 %v4261_v2, %s4193_s30  ;;  %v4269_v4 = vld [vmem:[%s293_s29 + $0x10] sm:$0xf]  ;;  %v3847_v5 = vpack.c.bf16 %v4267_v3, %v4259_v1  ;;  %s5605_s29 = scalar_lea.vmem %s5656_s0, %s3838_s26 }
  0x12   : > { %v3850_v6 = vpack.c.bf16 %v4269_v4, %v4261_v2 }
  0x15   : > { %340 = vrot.lane.b32.xlu1 %v4267_v3, %s4193_s30  ;;  %336 = vrot.lane.b32.xlu0 %v4269_v4, %s4193_s30 }
  0x19   : > { %594 = vrot.lane.b32.xlu1 %v4269_v4, %s4194_s8  ;;  %592 = vrot.lane.b32.xlu0 %v4261_v2, %s4194_s8 }
  0x1d   : > { %598 = vrot.lane.b32.xlu1 %v4267_v3, %s4194_s8  ;;  %596 = vrot.lane.b32.xlu0 %v4259_v1, %s4194_s8 }
  0x21   : > { %749 = vrot.lane.b32.xlu1 %v4269_v4, %s4195_s9  ;;  %747 = vrot.lane.b32.xlu0 %v4261_v2, %s4195_s9 }
  0x25   : > { %753 = vrot.lane.b32.xlu1 %v4267_v3, %s4195_s9  ;;  %751 = vrot.lane.b32.xlu0 %v4259_v1, %s4195_s9 }
  0x29   : > { %905 = vrot.lane.b32.xlu1 %v4269_v4, %s4196_s10  ;;  %903 = vrot.lane.b32.xlu0 %v4261_v2, %s4196_s10 }
  0x2d   : > { %909 = vrot.lane.b32.xlu1 %v4267_v3, %s4196_s10  ;;  %907 = vrot.lane.b32.xlu0 %v4259_v1, %s4196_s10 }
  0x31   : > { %1060 = vrot.lane.b32.xlu1 %v4269_v4, %s4197_s11  ;;  %1058 = vrot.lane.b32.xlu0 %v4261_v2, %s4197_s11 }
  0x35   : > { %1064 = vrot.lane.b32.xlu1 %v4267_v3, %s4197_s11  ;;  %1062 = vrot.lane.b32.xlu0 %v4259_v1, %s4197_s11 }
  0x39   : > { %1215 = vrot.lane.b32.xlu1 %v4269_v4, %s4198_s12  ;;  %1213 = vrot.lane.b32.xlu0 %v4261_v2, %s4198_s12 }
  0x3d   : > { %1219 = vrot.lane.b32.xlu1 %v4267_v3, %s4198_s12  ;;  %1217 = vrot.lane.b32.xlu0 %v4259_v1, %s4198_s12 }
  0x41   : > { %1371 = vrot.lane.b32.xlu1 %v4269_v4, %s4199_s13  ;;  %1369 = vrot.lane.b32.xlu0 %v4261_v2, %s4199_s13 }
  0x45   : > { %1375 = vrot.lane.b32.xlu1 %v4267_v3, %s4199_s13  ;;  %1373 = vrot.lane.b32.xlu0 %v4259_v1, %s4199_s13 }
  0x49   : > { %1526 = vrot.lane.b32.xlu1 %v4269_v4, %s4200_s14  ;;  %1524 = vrot.lane.b32.xlu0 %v4261_v2, %s4200_s14  ;;  %v314_v4 = vld [vmem:[%s5659_s3 + $0x8] sm:$0xff] }
  0x4d   : > { %1530 = vrot.lane.b32.xlu1 %v4267_v3, %s4200_s14  ;;  %1528 = vrot.lane.b32.xlu0 %v4259_v1, %s4200_s14  ;;  %v375_v1 = vld [vmem:[%s5658_s2 + $0x18] sm:$0xff] }
  0x51   : > { %1686 = vperm.xlu1 %4183, %v314_v4   ;;  %v3613_v4 = vrot.slane %v4338_v8, 9 }
  0x83   : > { %v339_v17 = vpop.permute.xlu1 %338  ;;  %v335_v18 = vpop.permute.xlu0 %334 }
  0x84   : > { %v345_v21 = vsel %vm344_vm0, %v335_v18, %v339_v17  ;;  %v347_v22 = vsel %vm344_vm0, %v339_v17, %v335_v18  ;;  %v922_v17 = vsub.s32 6, %v4341_v10  ;;  %v315_v18 = vld [vmem:[%s5659_s3 + $0x10] sm:$0xff] }
  0x85   : > { %v368_v28 = vmul.f32 %v4357_v19, %v347_v22  ;;  %v369_v30 = vmul.f32 %v4360_v20, %v345_v21  ;;  %v316_v21 = vld [vmem:[%s5659_s3 + $0x18] sm:$0xff]  ;;  %v3615_v22 = vld [vmem:[%s5658_s2 + $0x88] sm:$0xff]  ;;  %1691 = vperm.xlu1 %4183, %v315_v18  }
  0x87   : > { %v341_v23 = vpop.permute.xlu1 %340  ;;  %v337_v24 = vpop.permute.xlu0 %336 }
  0x88   : > { %v346_v25 = vsel %vm344_vm0, %v337_v24, %v341_v23  ;;  %v348_v26 = vsel %vm344_vm0, %v341_v23, %v337_v24  ;;  %v764_v23 = vrot.slane %v4397_v42, %v4347_v12  ;;  %v918_v24 = vsub.s32 2, %v4341_v10  ;;  %v3630_v42 = vld [vmem:[%s5658_s2 + $0x20] sm:$0xff] }
  0x89   : > { %v370_v29 = vmul.f32 %v4357_v19, %v348_v26  ;;  %v371_v31 = vmul.f32 %v4360_v20, %v346_v25  ;;  %v923_v25 = vrot.slane %v4338_v8, %v922_v17  ;;  %v3641_v17 = vld [vmem:[%s5658_s2 + $0x48] sm:$0xff] }
  0x8a   : > { %v919_v48 = vrot.slane %v4338_v8, %v918_v24 }
  0x8b   : > { %v3841_v33 = vpack.c.bf16 %v371_v31, %v369_v30  ;;  %v3844_v34 = vpack.c.bf16 %v370_v29, %v368_v28  ;;  %v595_v35 = vpop.permute.xlu1 %594  ;;  %v593_v36 = vpop.permute.xlu0 %592  ;;  %v3616_v28 = vld [vmem:[%s5658_s2 + $0x90] sm:$0xff]  ;;  %v4487_v29 = vrot.slane %v764_v23, %v4347_v12 }
  0x8d   : > { %3843 = vmatprep.subr.msk.bf16.mxu0 %vm4375_vm3, %v3841_v33  ;;  %v4493_v33 = vrot.slane %v923_v25, %v918_v24  ;;  %v3642_v25 = vld [vmem:[%s5658_s2 + $0x50] sm:$0xff] }
  0x8e   : > { %3846 = vmatpush1.bf16.msk.msra.mxu0 %vm4375_vm3, %v3844_v34 }
  0x8f   : > { %3849 = vmatprep.subr.msk.bf16.mxu0 %vm4375_vm3, %v3847_v5  ;;  %v599_v40 = vpop.permute.xlu1 %598  ;;  %v597_v41 = vpop.permute.xlu0 %596  ;;  %v313_v5 = vld [vmem:[%s5659_s3] sm:$0xff] }
  0x90   : > { %v602_v43 = vsel %vm600_vm4, %v595_v35, %v599_v40  ;;  %v601_v44 = vsel %vm600_vm4, %v593_v36, %v597_v41  ;;  %v604_v55 = vsel %vm600_vm4, %v599_v40, %v595_v35  ;;  %v603_v56 = vsel %vm600_vm4, %v597_v41, %v593_v36  ;;  %1681 = vperm.xlu0 %4182, %v313_v5  }
  0x91   : > { %3620 = vmatmul.mubr.msk.f32.vlgmr.msra.gmra.mrb[0].mxu0 %vm376_vm5, %v372_v39  ;;  %v626_v45 = vmul.f32 %v4384_v38, %v602_v43  ;;  %v624_v46 = vmul.f32 %v4384_v38, %v601_v44  ;;  %v625_v62 = vmul.f32 %v4427_v54, %v604_v55  ;;  %v623_v63 = vmul.f32 %v4427_v54, %v603_v56 }
  0x92   : > { %466 = vmatprep.mubr.f32.mxu0 %v4192_v0  ;;  %3852 = vmatpush1.bf16.msk.msra.mxu0 %vm4375_vm3, %v3850_v6  ;;  %v4532_v55 = vrot.slane %v919_v48, %v918_v24 }
  0x93   : > { %v3853_v49 = vpack.c.bf16 %v626_v45, %v624_v46  ;;  %v750_v50 = vpop.permute.xlu1 %749  ;;  %v748_v51 = vpop.permute.xlu0 %747  ;;  %v3856_v6 = vpack.c.bf16 %v625_v62, %v623_v63  ;;  %v1077_v46 = vsub.s32 7, %v4341_v10 }
  0x94   : > { %1696 = vperm.xlu0 %4182, %v316_v21   ;;  %v4574_v21 = vsub.s32 1, %v4341_v10 }
  0x95   : > { %3621 = vmatmul.mubr.msk.f32.gmra.mrb[2].mxu0 %vm376_vm5, %v373_v47  ;;  %3855 = vmatprep.subr.msk.bf16.mxu0 %vm4375_vm3, %v3853_v49  ;;  %v3631_v47 = vld [vmem:[%s5658_s2 + $0x28] sm:$0xff]  ;;  %v1073_v49 = vsub.s32 3, %v4341_v10 }
  0x96   : > { %472 = vmatprep.mubr.f32.mxu0 %v4192_v0 }
  0x97   : > { %v754_v58 = vpop.permute.xlu1 %753  ;;  %v752_v59 = vpop.permute.xlu0 %751  ;;  %v1074_v18 = vrot.slane %v4338_v8, %v1073_v49 }
  0x98   : > { %v757_v60 = vsel %vm755_vm6, %v750_v50, %v754_v58  ;;  %v756_v61 = vsel %vm755_vm6, %v748_v51, %v752_v59  ;;  %v759_v30 = vsel %vm755_vm6, %v754_v58, %v750_v50  ;;  %v758_v31 = vsel %vm755_vm6, %v752_v59, %v748_v51 }
  0x99   : > { %3622 = vmatmul.mubr.msk.f32.gmra.mrb[4].mxu0 %vm376_vm5, %v374_v53  ;;  %v782_v2 = vmul.f32 %v4434_v57, %v757_v60  ;;  %v780_v3 = vmul.f32 %v4434_v57, %v756_v61  ;;  %v781_v36 = vmul.f32 %v4487_v29, %v759_v30  ;;  %v779_v12 = vmul.f32 %v4487_v29, %v758_v31  ;;  %v3632_v53 = vld [vmem:[%s5658_s2 + $0x30] sm:$0xff] }
  0x9a   : > { %478 = vmatprep.mubr.f32.mxu0 %v4192_v0  ;;  %v1078_v50 = vrot.slane %v4338_v8, %v1077_v46 }
  0x9b   : > { %v3859_v13 = vpack.c.bf16 %v782_v2, %v780_v3  ;;  %v906_v15 = vpop.permute.xlu1 %905  ;;  %v904_v16 = vpop.permute.xlu0 %903  ;;  %v3862_v41 = vpack.c.bf16 %v781_v36, %v779_v12  ;;  %v3643_v36 = vld [vmem:[%s5658_s2 + $0x58] sm:$0xff] }
  0x9c   : > { %v4538_v59 = vrot.slane %v1078_v50, %v1073_v49 }
  0x9d   : > { %3623 = vmatmul.mubr.msk.f32.gmra.mrb[6].mxu0 %vm376_vm5, %v375_v1  ;;  %v3633_v1 = vld [vmem:[%s5658_s2 + $0x38] sm:$0xff] }
  0x9e   : > { %567 = vmatprep.mubr.f32.mxu0 %v4192_v0 }
  0x9f   : > { %v910_v26 = vpop.permute.xlu1 %909  ;;  %v908_v27 = vpop.permute.xlu0 %907 }
  0xa0   : > { %v913_v34 = vsel %vm911_vm7, %v906_v15, %v910_v26  ;;  %v912_v35 = vsel %vm911_vm7, %v904_v16, %v908_v27  ;;  %v915_v56 = vsel %vm911_vm7, %v910_v26, %v906_v15  ;;  %v914_v58 = vsel %vm911_vm7, %v908_v27, %v904_v16 }
  0xa1   : > { %3626 = vmatmul.mubr.msk.f32.vlgmr.msra.gmra.mrb[0].mxu0 %vm376_vm5, %v3614_v7  ;;  %v937_v39 = vmul.f32 %v4493_v33, %v913_v34  ;;  %v935_v40 = vmul.f32 %v4493_v33, %v912_v35  ;;  %v936_v62 = vmul.f32 %v4532_v55, %v915_v56  ;;  %v934_v63 = vmul.f32 %v4532_v55, %v914_v58 }
  0xa2   : > { %3858 = vmatpush1.bf16.msk.msra.mxu0 %vm4375_vm3, %v3856_v6  ;;  %573 = vmatprep.mubr.f32.mxu0 %v4192_v0  ;;  %v3640_v6 = vld [vmem:[%s5658_s2 + $0x40] sm:$0xff]  ;;  %v312_v15 = vmul.f32 %v3613_v4, %v4338_v8  ;;  %v4561_v16 = vsub.s32 5, %v4341_v10  ;;  %v4583_v26 = vrot.slane %v1074_v18, %v1073_v49  ;;  %v3652_v49 = vld [vmem:[%s5658_s2 + $0x70] sm:$0xff] }
  0xa3   : > { %3861 = vmatprep.subr.msk.bf16.mxu0 %vm4375_vm3, %v3859_v13  ;;  %v3865_v43 = vpack.c.bf16 %v937_v39, %v935_v40  ;;  %v1061_v44 = vpop.permute.xlu1 %1060  ;;  %v1059_v45 = vpop.permute.xlu0 %1058  ;;  %v3868_v5 = vpack.c.bf16 %v936_v62, %v934_v63  ;;  %v3650_v40 = vld [vmem:[%s5658_s2 + $0x60] sm:$0xff]  ;;  %v3653_v62 = vld [vmem:[%s5658_s2 + $0x78] sm:$0xff]  ;;  %v3662_v18 = vld [vmem:[%s5658_s2 + $0xb0] sm:$0xff] }
  0xa4   : > { %v1389_v46 = vrot.slane %v4338_v8, %v4561_v16 }
  0xa5   : > { %3627 = vmatmul.mubr.msk.f32.gmra.mrb[2].mxu0 %vm376_vm5, %v3615_v22  ;;  %v1234_v22 = vrot.slane %v312_v15, %v4561_v16 }
  0xa6   : > { %579 = vmatprep.mubr.f32.mxu0 %v4192_v0 }
  0xa7   : > { %v1065_v51 = vpop.permute.xlu1 %1064  ;;  %v1063_v52 = vpop.permute.xlu0 %1062 }
  0xa8   : > { %v1070_v60 = vsel %vm1066_vm8, %v1065_v51, %v1061_v44  ;;  %v1069_v61 = vsel %vm1066_vm8, %v1063_v52, %v1059_v45  ;;  %v1068_v10 = vsel %vm1066_vm8, %v1061_v44, %v1065_v51  ;;  %v1067_v27 = vsel %vm1066_vm8, %v1059_v45, %v1063_v52  ;;  %v3651_v44 = vld [vmem:[%s5658_s2 + $0x68] sm:$0xff] }
  0xa9   : > { %3628 = vmatmul.mubr.msk.f32.gmra.mrb[4].mxu0 %vm376_vm5, %v3616_v28  ;;  %v1092_v2 = vmul.f32 %v4538_v59, %v1070_v60  ;;  %v1090_v3 = vmul.f32 %v4538_v59, %v1069_v61  ;;  %v4590_v28 = vrot.slane %v1234_v22, %v4574_v21  ;;  %v1091_v34 = vmul.f32 %v4583_v26, %v1068_v10 }
  0xaa   : > { %585 = vmatprep.mubr.f32.mxu0 %v4192_v0  ;;  %v1089_v35 = vmul.f32 %v4583_v26, %v1067_v27  ;;  %v1230_v45 = vrot.slane %v312_v15, %v4574_v21 }
  0xab   : > { %v3871_v7 = vpack.c.bf16 %v1092_v2, %v1090_v3  ;;  %v1216_v9 = vpop.permute.xlu1 %1215  ;;  %v1214_v13 = vpop.permute.xlu0 %1213  ;;  %v3660_v3 = vld [vmem:[%s5658_s2 + $0xa0] sm:$0xff] }
  0xac   : > { %v3874_v39 = vpack.c.bf16 %v1091_v34, %v1089_v35  ;;  %v4629_v50 = vrot.slane %v1230_v45, %v4574_v21  ;;  %v3673_v45 = vld [vmem:[%s5658_s2 + $0xd8] sm:$0xff] }
  0xad   : > { %3629 = vmatmul.mubr.msk.f32.gmra.mrb[6].mxu0 %vm376_vm5, %v3617_v37 }
  0xae   : > { %714 = vmatprep.mubr.f32.mxu0 %v4192_v0 }
  0xaf   : > { %v1220_v23 = vpop.permute.xlu1 %1219  ;;  %v1218_v24 = vpop.permute.xlu0 %1217 }
  0xb0   : > { %v1225_v30 = vsel %vm1221_vm9, %v1220_v23, %v1216_v9  ;;  %v1224_v31 = vsel %vm1221_vm9, %v1218_v24, %v1214_v13  ;;  %v1223_v51 = vsel %vm1221_vm9, %v1216_v9, %v1220_v23  ;;  %v1222_v52 = vsel %vm1221_vm9, %v1214_v13, %v1218_v24 }
  0xb1   : > { %3636 = vmatmul.mubr.msk.f32.vlgmr.msra.gmra.mrb[0].mxu0 %vm376_vm5, %v3630_v42  ;;  %v1248_v12 = vmul.f32 %v4590_v28, %v1225_v30  ;;  %v1246_v37 = vmul.f32 %v4590_v28, %v1224_v31  ;;  %v1247_v60 = vmul.f32 %v4629_v50, %v1223_v51  ;;  %v1245_v61 = vmul.f32 %v4629_v50, %v1222_v52  ;;  %v3663_v30 = vld [vmem:[%s5658_s2 + $0xb8] sm:$0xff]  ;;  %v3691_v51 = vld [vmem:[%s5658_s2 + $0x108] sm:$0xff]  ;;  %v3692_v52 = vld [vmem:[%s5658_s2 + $0x110] sm:$0xff] }
  0xb2   : > { %3864 = vmatpush1.bf16.msk.msra.mxu0 %vm4375_vm3, %v3862_v41  ;;  %720 = vmatprep.mubr.f32.mxu0 %v4192_v0  ;;  %v1385_v9 = vrot.slane %v4338_v8, %v4574_v21  ;;  %v1544_v13 = vrot.slane %v4344_v11, %v4561_v16 }
  0xb3   : > { %3867 = vmatprep.subr.msk.bf16.mxu0 %vm4375_vm3, %v3865_v43  ;;  %v3877_v41 = vpack.c.bf16 %v1248_v12, %v1246_v37  ;;  %v1372_v42 = vpop.permute.xlu1 %1371  ;;  %v1370_v43 = vpop.permute.xlu0 %1369  ;;  %v3880_v2 = vpack.c.bf16 %v1247_v60, %v1245_v61  ;;  %v3671_v37 = vld [vmem:[%s5658_s2 + $0xc8] sm:$0xff] }
  0xb4   : > { %v4676_v8 = vrot.slane %v1385_v9, %v4574_v21  ;;  %v4683_v23 = vrot.slane %v1544_v13, %v4574_v21 }
  0xb5   : > { %3637 = vmatmul.mubr.msk.f32.gmra.mrb[2].mxu0 %vm376_vm5, %v3631_v47 }
  0xb6   : > { %726 = vmatprep.mubr.f32.mxu0 %v4192_v0 }
  0xb7   : > { %v1376_v47 = vpop.permute.xlu1 %1375  ;;  %v1374_v48 = vpop.permute.xlu0 %1373 }
  0xb8   : > { %v1381_v56 = vsel %vm1377_vm10, %v1376_v47, %v1372_v42  ;;  %v1380_v58 = vsel %vm1377_vm10, %v1374_v48, %v1370_v43  ;;  %v1379_v22 = vsel %vm1377_vm10, %v1372_v42, %v1376_v47  ;;  %v1378_v16 = vsel %vm1377_vm10, %v1370_v43, %v1374_v48  ;;  %v3681_v47 = vld [vmem:[%s5658_s2 + $0xe8] sm:$0xff]  ;;  %v3682_v48 = vld [vmem:[%s5658_s2 + $0xf0] sm:$0xff] }
  0xb9   : > { %3638 = vmatmul.mubr.msk.f32.gmra.mrb[4].mxu0 %vm376_vm5, %v3632_v53  ;;  %v4636_v53 = vrot.slane %v1389_v46, %v4574_v21  ;;  %v1402_v10 = vmul.f32 %v4676_v8, %v1379_v22  ;;  %v1400_v27 = vmul.f32 %v4676_v8, %v1378_v16  ;;  %v3680_v46 = vld [vmem:[%s5658_s2 + $0xe0] sm:$0xff] }
  0xba   : > { %732 = vmatprep.mubr.f32.mxu0 %v4192_v0 }
  0xbb   : > { %v1403_v63 = vmul.f32 %v4636_v53, %v1381_v56  ;;  %v3886_v35 = vpack.c.bf16 %v1402_v10, %v1400_v27  ;;  %v3693_v56 = vld [vmem:[%s5658_s2 + $0x118] sm:$0xff] }
  0xbd   : > { %3639 = vmatmul.mubr.msk.f32.gmra.mrb[6].mxu0 %vm376_vm5, %v3633_v1  ;;  %v1401_v1 = vmul.f32 %v4636_v53, %v1380_v58 }
  0xbe   : > { %870 = vmatprep.mubr.f32.mxu0 %v4192_v0 }
  0xbf   : > { %v3883_v4 = vpack.c.bf16 %v1403_v63, %v1401_v1 }
  0xc1   : > { %3646 = vmatmul.mubr.msk.f32.vlgmr.msra.gmra.mrb[0].mxu0 %vm376_vm5, %v3640_v6  ;;  %v1525_v6 = vpop.permute.xlu0 %1524 }
  0xc2   : > { %3870 = vmatpush1.bf16.msk.msra.mxu0 %vm4375_vm3, %v3868_v5  ;;  %876 = vmatprep.mubr.f32.mxu0 %v4192_v0  ;;  %v1527_v5 = vpop.permute.xlu1 %1526 }
  0xc3   : > { %3873 = vmatprep.subr.msk.bf16.mxu0 %vm4375_vm3, %v3871_v7  ;;  %v3661_v7 = vld [vmem:[%s5658_s2 + $0xa8] sm:$0xff] }
  0xc5   : > { %3647 = vmatmul.mubr.msk.f32.gmra.mrb[2].mxu0 %vm376_vm5, %v3641_v17  ;;  %v1529_v17 = vpop.permute.xlu0 %1528 }
  0xc6   : > { %882 = vmatprep.mubr.f32.mxu0 %v4192_v0  ;;  %v1531_v15 = vpop.permute.xlu1 %1530 }
  0xc7   : > { %v1536_v24 = vsel %vm1532_vm11, %v1531_v15, %v1527_v5  ;;  %v1534_v42 = vsel %vm1532_vm11, %v1527_v5, %v1531_v15 }
  0xc8   : > { %v1558_v31 = vmul.f32 %v4683_v23, %v1536_v24 }
  0xc9   : > { %3648 = vmatmul.mubr.msk.f32.gmra.mrb[4].mxu0 %vm376_vm5, %v3642_v25  ;;  %v1535_v25 = vsel %vm1532_vm11, %v1529_v17, %v1525_v6 }
  0xca   : > { %888 = vmatprep.mubr.f32.mxu0 %v4192_v0  ;;  %v1556_v34 = vmul.f32 %v4683_v23, %v1535_v25 }
  0xcc   : > { %v3889_v12 = vpack.c.bf16 %v1558_v31, %v1556_v34 }
  0xcd   : > { %3649 = vmatmul.mubr.msk.f32.gmra.mrb[6].mxu0 %vm376_vm5, %v3643_v36  ;;  %v3670_v36 = vld [vmem:[%s5658_s2 + $0xc0] sm:$0xff] }
  0xce   : > { %1025 = vmatprep.mubr.f32.mxu0 %v4192_v0 }
  0xd0   : > { %v1687_v63 = vpop.permute.xlu1 %1686 }
  0xd1   : > { %3656 = vmatmul.mubr.msk.f32.vlgmr.msra.gmra.mrb[0].mxu0 %vm376_vm5, %v3650_v40  ;;  %v3672_v40 = vld [vmem:[%s5658_s2 + $0xd0] sm:$0xff] }
  0xd2   : > { %3876 = vmatpush1.bf16.msk.msra.mxu0 %vm4375_vm3, %v3874_v39  ;;  %1031 = vmatprep.mubr.f32.mxu0 %v4192_v0  ;;  %v1540_v39 = vrot.slane %v4344_v11, %v4574_v21  ;;  %v1533_v11 = vsel %vm1532_vm11, %v1525_v6, %v1529_v17 }
  0xd3   : > { %3879 = vmatprep.subr.msk.bf16.mxu0 %vm4375_vm3, %v3877_v41 }
  0xd4   : > { %v4720_v41 = vrot.slane %v1540_v39, %v4574_v21 }
  0xd5   : > { %3657 = vmatmul.mubr.msk.f32.gmra.mrb[2].mxu0 %vm376_vm5, %v3651_v44 }
  0xd6   : > { %1037 = vmatprep.mubr.f32.mxu0 %v4192_v0  ;;  %v1557_v43 = vmul.f32 %v4720_v41, %v1534_v42  ;;  %v1555_v44 = vmul.f32 %v4720_v41, %v1533_v11 }
  0xd8   : > { %v3892_v21 = vpack.c.bf16 %v1557_v43, %v1555_v44 }
  0xd9   : > { %3658 = vmatmul.mubr.msk.f32.gmra.mrb[4].mxu0 %vm376_vm5, %v3652_v49  ;;  %v3690_v49 = vld [vmem:[%s5658_s2 + $0x100] sm:$0xff] }
  0xda   : > { %1043 = vmatprep.mubr.f32.mxu0 %v4192_v0 }
  0xdd   : > { %3659 = vmatmul.mubr.msk.f32.gmra.mrb[6].mxu0 %vm376_vm5, %v3653_v62 }
  0xde   : > { %1180 = vmatprep.mubr.f32.mxu0 %v4192_v0 }
  0xe1   : > { %3666 = vmatmul.mubr.msk.f32.vlgmr.msra.gmra.mrb[0].mxu0 %vm376_vm5, %v3660_v3 }
  0xe2   : > { %3882 = vmatpush1.bf16.msk.msra.mxu0 %vm4375_vm3, %v3880_v2  ;;  %1186 = vmatprep.mubr.f32.mxu0 %v4192_v0 }
  0xe3   : > { %3885 = vmatprep.subr.msk.bf16.mxu0 %vm4375_vm3, %v3883_v4 }
  0xe5   : > { %3667 = vmatmul.mubr.msk.f32.gmra.mrb[2].mxu0 %vm376_vm5, %v3661_v7 }
  0xe6   : > { %1192 = vmatprep.mubr.f32.mxu0 %v4192_v0 }
  0xe9   : > { %3668 = vmatmul.mubr.msk.f32.gmra.mrb[4].mxu0 %vm376_vm5, %v3662_v18 }
  0xea   : > { %1198 = vmatprep.mubr.f32.mxu0 %v4192_v0 }
  0xed   : > { %3669 = vmatmul.mubr.msk.f32.gmra.mrb[6].mxu0 %vm376_vm5, %v3663_v30 }
  0xee   : > { %1336 = vmatprep.mubr.f32.mxu0 %v4192_v0 }
  0xf1   : > { %3676 = vmatmul.mubr.msk.f32.vlgmr.msra.gmra.mrb[0].mxu0 %vm376_vm5, %v3670_v36 }
  0xf2   : > { %3888 = vmatpush1.bf16.msk.msra.mxu0 %vm4375_vm3, %v3886_v35  ;;  %1342 = vmatprep.mubr.f32.mxu0 %v4192_v0 }
  0xf3   : > { %3891 = vmatprep.subr.msk.bf16.mxu0 %vm4375_vm3, %v3889_v12 }
  0xf5   : > { %3677 = vmatmul.mubr.msk.f32.gmra.mrb[2].mxu0 %vm376_vm5, %v3671_v37 }
  0xf6   : > { %1348 = vmatprep.mubr.f32.mxu0 %v4192_v0 }
  0xf9   : > { %3678 = vmatmul.mubr.msk.f32.gmra.mrb[4].mxu0 %vm376_vm5, %v3672_v40 }
  0xfa   : > { %1354 = vmatprep.mubr.f32.mxu0 %v4192_v0 }
  0xfd   : > { %3679 = vmatmul.mubr.msk.f32.gmra.mrb[6].mxu0 %vm376_vm5, %v3673_v45 }
  0xfe   : > { %1491 = vmatprep.mubr.f32.mxu0 %v4192_v0 }
 0x101   : > { %3686 = vmatmul.mubr.msk.f32.vlgmr.msra.gmra.mrb[0].mxu0 %vm376_vm5, %v3680_v46 }
 0x102   : > { %3894 = vmatpush1.bf16.msk.msra.mxu0 %vm4375_vm3, %v3892_v21  ;;  %1497 = vmatprep.mubr.f32.mxu0 %v4192_v0 }
 0x104   : > { %v1692_v13 = vpop.permute.xlu1 %1691 }
 0x105   : > { %3687 = vmatmul.mubr.msk.f32.gmra.mrb[2].mxu0 %vm376_vm5, %v3681_v47 }
 0x106   : > { %1503 = vmatprep.mubr.f32.mxu0 %v4192_v0 }
 0x109   : > { %3688 = vmatmul.mubr.msk.f32.gmra.mrb[4].mxu0 %vm376_vm5, %v3682_v48 }
 0x10a   : > { %1509 = vmatprep.mubr.f32.mxu0 %v4192_v0 }
 0x10d   : > { %3689 = vmatmul.mubr.msk.f32.gmra.mrb[6].mxu0 %vm376_vm5, %v3683_v32  ;;  %v317_v32 = vld [vmem:[%s5661_s5] sm:$0xff] }
 0x10e   : > { %1646 = vmatprep.mubr.f32.mxu0 %v4192_v0 }
 0x10f   : > { %v1682_v58 = vpop.permute.xlu0 %1681 }
 0x111   : > { %3696 = vmatmul.mubr.msk.f32.vlgmr.msra.gmra.mrb[0].mxu0 %vm376_vm5, %v3690_v49 }
 0x112   : > { %1652 = vmatprep.mubr.f32.mxu0 %v4192_v0 }
 0x113   : > { %v1697_v25 = vpop.permute.xlu0 %1696 }
 0x115   : > { %3697 = vmatmul.mubr.msk.f32.gmra.mrb[2].mxu0 %vm376_vm5, %v3691_v51 }
 0x116   : > { %1658 = vmatprep.mubr.f32.mxu0 %v4192_v0 }
 0x119   : > { %3698 = vmatmul.mubr.msk.f32.gmra.mrb[4].mxu0 %vm376_vm5, %v3692_v52 }
 0x11a   : > { %1664 = vmatprep.mubr.f32.mxu0 %v4192_v0 }
 0x11d   : > { %3699 = vmatmul.mubr.msk.f32.gmra.mrb[6].mxu0 %vm376_vm5, %v3693_v56 }
 0x11e   : > { %1853 = vmatprep.mubr.f32.mxu0 %v4192_v0 }
 0x1e4   : > { %v1648_v60 = vpop.f32.mrb[0].mxu0 }
 0x1e5   : > { %v1699_v61 = vadd.f32 %v1682_v58, %v1648_v60  ;;  %v1650_v62 = vpop.f32.mrb[1].mxu0 }
 0x1e6   : > { %v1700_v2 = vadd.f32 %v1682_v58, %v1650_v62 }
 0x1e7   : > { %v4777_v1 = vmax.f32 %v1699_v61, 0.0  ;;  %v319_v61 = vld [vmem:[%s5661_s5 + $0x10] sm:$0xff] }
 0x1e8   : > { %v1654_v3 = vpop.f32.mrb[2].mxu0  ;;  %v4781_v6 = vmax.f32 %v1700_v2, 0.0  ;;  %v318_v2 = vld [vmem:[%s5661_s5 + $0x8] sm:$0xff] }
 0x1e9   : > { %v1701_v4 = vadd.f32 %v1687_v63, %v1654_v3  ;;  %2039 = vrot.lane.b32.xlu1 %v4777_v1, %s4194_s8  ;;  %v1656_v5 = vpop.f32.mrb[3].mxu0 }
 0x1ea   : > { %v1702_v9 = vadd.f32 %v1687_v63, %v1656_v5 }
 0x1eb   : > { %v4783_v7 = vmax.f32 %v1701_v4, 0.0 }
 0x1ec   : > { %v1660_v15 = vpop.f32.mrb[4].mxu0  ;;  %v4789_v22 = vmax.f32 %v1702_v9, 0.0 }
 0x1ed   : > { %v1703_v17 = vadd.f32 %v1692_v13, %v1660_v15  ;;  %2047 = vrot.lane.b32.xlu1 %v4781_v6, %s4194_s8  ;;  %2041 = vrot.lane.b32.xlu0 %v4783_v7, %s4194_s8  ;;  %v1662_v18 = vpop.f32.mrb[5].mxu0 }
 0x1ee   : > { %v1704_v24 = vadd.f32 %v1692_v13, %v1662_v18 }
 0x1ef   : > { %v4791_v16 = vmax.f32 %v1703_v17, 0.0  ;;  %v321_v17 = vld [vmem:[%s5661_s5 + $0x20] sm:$0xff] }
 0x1f0   : > { %v1666_v10 = vpop.f32.mrb[6].mxu0  ;;  %v4797_v31 = vmax.f32 %v1704_v24, 0.0 }
 0x1f1   : > { %v1705_v27 = vadd.f32 %v1697_v25, %v1666_v10  ;;  %2049 = vrot.lane.b32.xlu0 %v4789_v22, %s4194_s8  ;;  %2043 = vrot.lane.b32.xlu1 %v4791_v16, %s4194_s8  ;;  %v1668_v30 = vpop.f32.mrb[7].mxu0 }
 0x1f2   : > { %v1706_v35 = vadd.f32 %v1697_v25, %v1668_v30  ;;  %v320_v25 = vld [vmem:[%s5661_s5 + $0x18] sm:$0xff]  ;;  %v323_v30 = vld [vmem:[%s5661_s5 + $0x30] sm:$0xff] }
 0x1f3   : > { %v4799_v34 = vmax.f32 %v1705_v27, 0.0 }
 0x1f4   : > { %v4805_v36 = vmax.f32 %v1706_v35, 0.0  ;;  %v3726_v35 = vld [vmem:[%s5660_s4 + $0x50] sm:$0xff] }
 0x1f5   : > { %2051 = vrot.lane.b32.xlu1 %v4797_v31, %s4194_s8  ;;  %2045 = vrot.lane.b32.xlu0 %v4799_v34, %s4194_s8 }
 0x1f9   : > { %2233 = vrot.lane.b32.xlu1 %v4777_v1, %s4195_s9  ;;  %2053 = vrot.lane.b32.xlu0 %v4805_v36, %s4194_s8 }
 0x1fd   : > { %2241 = vrot.lane.b32.xlu1 %v4781_v6, %s4195_s9  ;;  %2235 = vrot.lane.b32.xlu0 %v4783_v7, %s4195_s9 }
 0x201   : > { %2237 = vrot.lane.b32.xlu1 %v4791_v16, %s4195_s9  ;;  %2243 = vrot.lane.b32.xlu0 %v4789_v22, %s4195_s9 }
 0x205   : > { %2245 = vrot.lane.b32.xlu1 %v4797_v31, %s4195_s9  ;;  %2239 = vrot.lane.b32.xlu0 %v4799_v34, %s4195_s9 }
 0x209   : > { %2427 = vrot.lane.b32.xlu1 %v4777_v1, %s4196_s10  ;;  %2247 = vrot.lane.b32.xlu0 %v4805_v36, %s4195_s9 }
 0x20d   : > { %2435 = vrot.lane.b32.xlu1 %v4781_v6, %s4196_s10  ;;  %2429 = vrot.lane.b32.xlu0 %v4783_v7, %s4196_s10 }
 0x211   : > { %2431 = vrot.lane.b32.xlu1 %v4791_v16, %s4196_s10  ;;  %2437 = vrot.lane.b32.xlu0 %v4789_v22, %s4196_s10 }
 0x215   : > { %2439 = vrot.lane.b32.xlu1 %v4797_v31, %s4196_s10  ;;  %2433 = vrot.lane.b32.xlu0 %v4799_v34, %s4196_s10 }
 0x219   : > { %2621 = vrot.lane.b32.xlu1 %v4777_v1, %s4197_s11  ;;  %2441 = vrot.lane.b32.xlu0 %v4805_v36, %s4196_s10 }
 0x21d   : > { %2629 = vrot.lane.b32.xlu1 %v4781_v6, %s4197_s11  ;;  %2623 = vrot.lane.b32.xlu0 %v4783_v7, %s4197_s11 }
 0x221   : > { %2625 = vrot.lane.b32.xlu1 %v4791_v16, %s4197_s11  ;;  %2631 = vrot.lane.b32.xlu0 %v4789_v22, %s4197_s11 }
 0x225   : > { %2633 = vrot.lane.b32.xlu1 %v4797_v31, %s4197_s11  ;;  %2627 = vrot.lane.b32.xlu0 %v4799_v34, %s4197_s11 }
 0x229   : > { %2815 = vrot.lane.b32.xlu1 %v4777_v1, %s4198_s12  ;;  %2635 = vrot.lane.b32.xlu0 %v4805_v36, %s4197_s11 }
 0x22d   : > { %2823 = vrot.lane.b32.xlu1 %v4781_v6, %s4198_s12  ;;  %2817 = vrot.lane.b32.xlu0 %v4783_v7, %s4198_s12 }
 0x231   : > { %2819 = vrot.lane.b32.xlu1 %v4791_v16, %s4198_s12  ;;  %2825 = vrot.lane.b32.xlu0 %v4789_v22, %s4198_s12 }
 0x235   : > { %2827 = vrot.lane.b32.xlu1 %v4797_v31, %s4198_s12  ;;  %2821 = vrot.lane.b32.xlu0 %v4799_v34, %s4198_s12 }
 0x239   : > { %1724 = vrot.lane.b32.xlu1 %v4777_v1, %s4193_s30  ;;  %2829 = vrot.lane.b32.xlu0 %v4805_v36, %s4198_s12 }
 0x23d   : > { %1732 = vrot.lane.b32.xlu1 %v4781_v6, %s4193_s30  ;;  %1726 = vrot.lane.b32.xlu0 %v4783_v7, %s4193_s30 }
 0x241   : > { %1728 = vrot.lane.b32.xlu1 %v4791_v16, %s4193_s30  ;;  %1734 = vrot.lane.b32.xlu0 %v4789_v22, %s4193_s30 }
 0x245   : > { %1736 = vrot.lane.b32.xlu1 %v4797_v31, %s4193_s30  ;;  %1730 = vrot.lane.b32.xlu0 %v4799_v34, %s4193_s30 }
 0x249   : > { %3009 = vrot.lane.b32.xlu1 %v4777_v1, %s4199_s13  ;;  %3011 = vrot.lane.b32.xlu0 %v4783_v7, %s4199_s13 }
 0x24d   : > { %3017 = vrot.lane.b32.xlu1 %v4781_v6, %s4199_s13  ;;  %3019 = vrot.lane.b32.xlu0 %v4789_v22, %s4199_s13 }
 0x251   : > { %3013 = vrot.lane.b32.xlu1 %v4791_v16, %s4199_s13  ;;  %1738 = vrot.lane.b32.xlu0 %v4805_v36, %s4193_s30 }
 0x255   : > { %3021 = vrot.lane.b32.xlu1 %v4797_v31, %s4199_s13  ;;  %3015 = vrot.lane.b32.xlu0 %v4799_v34, %s4199_s13 }
 0x259   : > { %3203 = vrot.lane.b32.xlu1 %v4777_v1, %s4200_s14  ;;  %3023 = vrot.lane.b32.xlu0 %v4805_v36, %s4199_s13 }
 0x25b   : > { %v2040_v12 = vpop.permute.xlu1 %2039 }
 0x25d   : > { %3211 = vrot.lane.b32.xlu1 %v4781_v6, %s4200_s14  ;;  %3205 = vrot.lane.b32.xlu0 %v4783_v7, %s4200_s14 }
 0x25f   : > { %v2048_v37 = vpop.permute.xlu1 %2047  ;;  %v2042_v39 = vpop.permute.xlu0 %2041 }
 0x260   : > { %v2059_v40 = vsel %vm600_vm4, %v2048_v37, %v2040_v12  ;;  %v2055_v42 = vsel %vm600_vm4, %v2040_v12, %v2048_v37 }
 0x261   : > { %3207 = vrot.lane.b32.xlu1 %v4791_v16, %s4200_s14  ;;  %3213 = vrot.lane.b32.xlu0 %v4789_v22, %s4200_s14  ;;  %v2063_v44 = vmul.f32 %v2059_v40, %v4427_v54  ;;  %v2064_v46 = vmul.f32 %v2055_v42, %v4384_v38 }
 0x263   : > { %v2050_v11 = vpop.permute.xlu0 %2049  ;;  %v2044_v43 = vpop.permute.xlu1 %2043 }
 0x264   : > { %v2056_v45 = vsel %vm600_vm4, %v2042_v39, %v2050_v11  ;;  %v2060_v21 = vsel %vm600_vm4, %v2050_v11, %v2042_v39  ;;  %v322_v39 = vld [vmem:[%s5661_s5 + $0x28] sm:$0xff] }
 0x265   : > { %v2065_v47 = vmul.f32 %v2060_v21, %v4427_v54  ;;  %v2066_v48 = vmul.f32 %v2056_v45, %v4384_v38  ;;  %3215 = vrot.lane.b32.xlu1 %v4797_v31, %s4200_s14  ;;  %3209 = vrot.lane.b32.xlu0 %v4799_v34, %s4200_s14  ;;  %v3727_v21 = vld [vmem:[%s5660_s4 + $0x58] sm:$0xff] }
 0x267   : > { %v2052_v49 = vpop.permute.xlu1 %2051  ;;  %v2046_v51 = vpop.permute.xlu0 %2045  ;;  %v4934_v52 = vpack.c.bf16 %v2066_v48, %v2064_v46  ;;  %v4936_v56 = vpack.c.bf16 %v2065_v47, %v2063_v44 }
 0x268   : > { %v2057_v58 = vsel %vm600_vm4, %v2044_v43, %v2052_v49  ;;  %v2061_v60 = vsel %vm600_vm4, %v2052_v49, %v2044_v43 }
 0x269   : > { %3967 = vmatprep.subr.bf16.mxu1 %v4934_v52  ;;  %3399 = vperm.xlu1 %4183, %v317_v32   ;;  %v2067_v5 = vmul.f32 %v2061_v60, %v4427_v54  ;;  %v2068_v9 = vmul.f32 %v2057_v58, %v4384_v38  ;;  %v324_v32 = vld [vmem:[%s5661_s5 + $0x38] sm:$0xff]  ;;  %v3728_v60 = vld [vmem:[%s5660_s4 + $0x60] sm:$0xff] }
 0x26a   : > { %3217 = vrot.lane.b32.xlu0 %v4805_v36, %s4200_s14  ;;  %3969 = vmatpush1.bf16.msra.mxu1 %v4936_v56 }
 0x26b   : > { %v2234_v62 = vpop.permute.xlu1 %2233  ;;  %v2054_v63 = vpop.permute.xlu0 %2053 }
 0x26c   : > { %v2058_v3 = vsel %vm600_vm4, %v2046_v51, %v2054_v63  ;;  %v2062_v4 = vsel %vm600_vm4, %v2054_v63, %v2046_v51 }
 0x26d   : > { %v2069_v13 = vmul.f32 %v2062_v4, %v4427_v54  ;;  %v2070_v15 = vmul.f32 %v2058_v3, %v4384_v38  ;;  %3409 = vperm.xlu1 %4183, %v319_v61  }
 0x26e   : > { %3404 = vperm.xlu0 %4182, %v318_v2  }
 0x26f   : > { %v2242_v18 = vpop.permute.xlu1 %2241  ;;  %v2236_v24 = vpop.permute.xlu0 %2235  ;;  %v4966_v10 = vpack.c.bf16 %v2070_v15, %v2068_v9  ;;  %v4968_v27 = vpack.c.bf16 %v2069_v13, %v2067_v5  ;;  %v3729_v13 = vld [vmem:[%s5660_s4 + $0x68] sm:$0xff] }
 0x270   : > { %v2253_v54 = vsel %vm755_vm6, %v2242_v18, %v2234_v62  ;;  %v2249_v38 = vsel %vm755_vm6, %v2234_v62, %v2242_v18 }
 0x271   : > { %3419 = vperm.xlu1 %4183, %v321_v17   ;;  %3968 = vmatprep.subr.bf16.mxu1 %v4966_v10  ;;  %v2257_v40 = vmul.f32 %v2253_v54, %v4487_v29  ;;  %v2258_v43 = vmul.f32 %v2249_v38, %v4434_v57 }
 0x272   : > { %3414 = vperm.xlu0 %4182, %v320_v25   ;;  %3970 = vmatpush1.bf16.msra.mxu1 %v4968_v27 }
 0x273   : > { %v2238_v12 = vpop.permute.xlu1 %2237  ;;  %v2244_v37 = vpop.permute.xlu0 %2243 }
 0x274   : > { %v2250_v42 = vsel %vm755_vm6, %v2236_v24, %v2244_v37  ;;  %v2254_v11 = vsel %vm755_vm6, %v2244_v37, %v2236_v24  ;;  %v3731_v37 = vld [vmem:[%s5660_s4 + $0x78] sm:$0xff] }
 0x275   : > { %v2259_v44 = vmul.f32 %v2254_v11, %v4487_v29  ;;  %v2260_v45 = vmul.f32 %v2250_v42, %v4434_v57  ;;  %3429 = vperm.xlu1 %4183, %v323_v30   ;;  %3734 = vmatmul.mubr.msk.f32.vlgmr.msra.gmra.mrb[0].mxu1 %vm1764_vm12, %v3726_v35 }
 0x276   : > { %3424 = vperm.xlu0 %4182, %v322_v39   ;;  %2186 = vmatprep.mubr.f32.mxu1 %v4192_v0 }
 0x277   : > { %v3921_v46 = vpack.c.bf16 %v2259_v44, %v2257_v40  ;;  %v2246_v47 = vpop.permute.xlu1 %2245  ;;  %v2240_v48 = vpop.permute.xlu0 %2239  ;;  %v3919_v49 = vpack.c.bf16 %v2260_v45, %v2258_v43 }
 0x278   : > { %v2251_v51 = vsel %vm755_vm6, %v2238_v12, %v2246_v47  ;;  %v2255_v58 = vsel %vm755_vm6, %v2246_v47, %v2238_v12 }
 0x279   : > { %3735 = vmatmul.mubr.msk.f32.gmra.mrb[2].mxu1 %vm1764_vm12, %v3727_v21  ;;  %3920 = vmatprep.subr.bf16.mxu1 %v3919_v49  ;;  %v2261_v3 = vmul.f32 %v2255_v58, %v4487_v29  ;;  %v2262_v4 = vmul.f32 %v2251_v51, %v4434_v57 }
 0x27a   : > { %3434 = vperm.xlu0 %4182, %v324_v32   ;;  %3922 = vmatpush1.bf16.msra.mxu1 %v3921_v46  ;;  %v3740_v46 = vld [vmem:[%s5660_s4 + $0x80] sm:$0xff] }
 0x27b   : > { %v2428_v61 = vpop.permute.xlu1 %2427  ;;  %v2248_v62 = vpop.permute.xlu0 %2247  ;;  %2192 = vmatprep.mubr.f32.mxu1 %v4192_v0 }
 0x27c   : > { %v2252_v63 = vsel %vm755_vm6, %v2240_v48, %v2248_v62  ;;  %v2256_v2 = vsel %vm755_vm6, %v2248_v62, %v2240_v48 }
 0x27d   : > { %v2263_v5 = vmul.f32 %v2256_v2, %v4487_v29  ;;  %v2264_v9 = vmul.f32 %v2252_v63, %v4434_v57  ;;  %3736 = vmatmul.mubr.msk.f32.gmra.mrb[4].mxu1 %vm1764_vm12, %v3728_v60  ;;  %v3730_v57 = vld [vmem:[%s5660_s4 + $0x70] sm:$0xff]  ;;  %v3741_v63 = vld [vmem:[%s5660_s4 + $0x88] sm:$0xff] }
 0x27e   : > { %2198 = vmatprep.mubr.f32.mxu1 %v4192_v0 }
 0x27f   : > { %v3925_v15 = vpack.c.bf16 %v2263_v5, %v2261_v3  ;;  %v2436_v17 = vpop.permute.xlu1 %2435  ;;  %v2430_v18 = vpop.permute.xlu0 %2429  ;;  %v3923_v24 = vpack.c.bf16 %v2264_v9, %v2262_v4 }
 0x280   : > { %v2443_v29 = vsel %vm911_vm7, %v2428_v61, %v2436_v17  ;;  %v2447_v39 = vsel %vm911_vm7, %v2436_v17, %v2428_v61 }
 0x281   : > { %3737 = vmatmul.mubr.msk.f32.gmra.mrb[6].mxu1 %vm1764_vm12, %v3729_v13  ;;  %3924 = vmatprep.subr.bf16.mxu1 %v3923_v24  ;;  %v2452_v30 = vmul.f32 %v2443_v29, %v4493_v33  ;;  %v2451_v44 = vmul.f32 %v2447_v39, %v4532_v55  ;;  %v3743_v24 = vld [vmem:[%s5660_s4 + $0x98] sm:$0xff]  ;;  %v3746_v39 = vld [vmem:[%s5660_s4 + $0xb0] sm:$0xff] }
 0x282   : > { %3926 = vmatpush1.bf16.msra.mxu1 %v3925_v15  ;;  %2204 = vmatprep.mubr.f32.mxu1 %v4192_v0 }
 0x283   : > { %v2432_v25 = vpop.permute.xlu1 %2431  ;;  %v2438_v54 = vpop.permute.xlu0 %2437 }
 0x284   : > { %v2444_v38 = vsel %vm911_vm7, %v2430_v18, %v2438_v54  ;;  %v2448_v35 = vsel %vm911_vm7, %v2438_v54, %v2430_v18  ;;  %v3744_v54 = vld [vmem:[%s5660_s4 + $0xa0] sm:$0xff] }
 0x285   : > { %v2454_v12 = vmul.f32 %v2444_v38, %v4493_v33  ;;  %3738 = vmatmul.mubr.msk.f32.gmra.mrb[8].mxu1 %vm1764_vm12, %v3730_v57  ;;  %v2453_v43 = vmul.f32 %v2448_v35, %v4532_v55  ;;  %v3745_v35 = vld [vmem:[%s5660_s4 + $0xa8] sm:$0xff] }
 0x286   : > { %2210 = vmatprep.mubr.f32.mxu1 %v4192_v0 }
 0x287   : > { %v2440_v40 = vpop.permute.xlu1 %2439  ;;  %v2434_v42 = vpop.permute.xlu0 %2433  ;;  %v3927_v11 = vpack.c.bf16 %v2454_v12, %v2452_v30  ;;  %v3929_v32 = vpack.c.bf16 %v2453_v43, %v2451_v44  ;;  %v3747_v44 = vld [vmem:[%s5660_s4 + $0xb8] sm:$0xff] }
 0x288   : > { %v2445_v45 = vsel %vm911_vm7, %v2432_v25, %v2440_v40  ;;  %v2449_v21 = vsel %vm911_vm7, %v2440_v40, %v2432_v25 }
 0x289   : > { %3739 = vmatmul.mubr.msk.f32.gmra.mrb[10].mxu1 %vm1764_vm12, %v3731_v37  ;;  %3928 = vmatprep.subr.bf16.mxu1 %v3927_v11  ;;  %v2455_v58 = vmul.f32 %v2449_v21, %v4532_v55  ;;  %v2456_v60 = vmul.f32 %v2445_v45, %v4493_v33 }
 0x28a   : > { %2362 = vmatprep.mubr.f32.mxu1 %v4192_v0 }
 0x28b   : > { %v2622_v47 = vpop.permute.xlu1 %2621  ;;  %v2442_v48 = vpop.permute.xlu0 %2441 }
 0x28c   : > { %v2446_v49 = vsel %vm911_vm7, %v2434_v42, %v2442_v48  ;;  %v2450_v51 = vsel %vm911_vm7, %v2442_v48, %v2434_v42 }
 0x28d   : > { %v2457_v61 = vmul.f32 %v2450_v51, %v4532_v55  ;;  %v2458_v62 = vmul.f32 %v2446_v49, %v4493_v33  ;;  %3748 = vmatmul.mubr.msk.f32.vlgmr.msra.gmra.mrb[12].mxu1 %vm1764_vm12, %v3740_v46  ;;  %v3742_v33 = vld [vmem:[%s5660_s4 + $0x90] sm:$0xff] }
 0x28e   : > { %3930 = vmatpush1.bf16.msra.mxu1 %v3929_v32  ;;  %2368 = vmatprep.mubr.f32.mxu1 %v4192_v0 }
 0x28f   : > { %v3933_v2 = vpack.c.bf16 %v2457_v61, %v2455_v58  ;;  %v2630_v3 = vpop.permute.xlu1 %2629  ;;  %v2624_v4 = vpop.permute.xlu0 %2623  ;;  %v3931_v5 = vpack.c.bf16 %v2458_v62, %v2456_v60  ;;  %v3756_v60 = vld [vmem:[%s5660_s4 + $0xc0] sm:$0xff] }
 0x290   : > { %v2641_v55 = vsel %vm1066_vm8, %v2630_v3, %v2622_v47  ;;  %v2637_v45 = vsel %vm1066_vm8, %v2622_v47, %v2630_v3 }
 0x291   : > { %3749 = vmatmul.mubr.msk.f32.gmra.mrb[14].mxu1 %vm1764_vm12, %v3741_v63  ;;  %3932 = vmatprep.subr.bf16.mxu1 %v3931_v5  ;;  %v2646_v17 = vmul.f32 %v2641_v55, %v4538_v59  ;;  %v2645_v58 = vmul.f32 %v2637_v45, %v4583_v26  ;;  %v3759_v45 = vld [vmem:[%s5660_s4 + $0xd8] sm:$0xff] }
 0x292   : > { %3934 = vmatpush1.bf16.msra.mxu1 %v3933_v2  ;;  %2374 = vmatprep.mubr.f32.mxu1 %v4192_v0 }
 0x293   : > { %v2626_v9 = vpop.permute.xlu1 %2625  ;;  %v2632_v13 = vpop.permute.xlu0 %2631 }
 0x294   : > { %v2642_v15 = vsel %vm1066_vm8, %v2632_v13, %v2624_v4  ;;  %v2638_v11 = vsel %vm1066_vm8, %v2624_v4, %v2632_v13 }
 0x295   : > { %v2648_v18 = vmul.f32 %v2642_v15, %v4538_v59  ;;  %3750 = vmatmul.mubr.msk.f32.gmra.mrb[0].mxu1 %vm1764_vm12, %v3742_v33  ;;  %v2647_v48 = vmul.f32 %v2638_v11, %v4583_v26 }
 0x296   : > { %2380 = vmatprep.mubr.f32.mxu1 %v4192_v0 }
 0x297   : > { %v2634_v29 = vpop.permute.xlu1 %2633  ;;  %v2628_v57 = vpop.permute.xlu0 %2627  ;;  %v3935_v25 = vpack.c.bf16 %v2648_v18, %v2646_v17  ;;  %v3937_v3 = vpack.c.bf16 %v2647_v48, %v2645_v58 }
 0x298   : > { %v2643_v32 = vsel %vm1066_vm8, %v2634_v29, %v2626_v9  ;;  %v2639_v61 = vsel %vm1066_vm8, %v2626_v9, %v2634_v29 }
 0x299   : > { %3751 = vmatmul.mubr.msk.f32.gmra.mrb[2].mxu1 %vm1764_vm12, %v3743_v24  ;;  %3936 = vmatprep.subr.bf16.mxu1 %v3935_v25  ;;  %v2650_v62 = vmul.f32 %v2643_v32, %v4538_v59  ;;  %v2649_v9 = vmul.f32 %v2639_v61, %v4583_v26 }
 0x29a   : > { %2386 = vmatprep.mubr.f32.mxu1 %v4192_v0 }
 0x29b   : > { %v5088_v38 = vpop.permute.xlu1 %2815  ;;  %v2636_v30 = vpop.permute.xlu0 %2635 }
 0x29c   : > { %v2644_v43 = vsel %vm1066_vm8, %v2636_v30, %v2628_v57  ;;  %v2640_v49 = vsel %vm1066_vm8, %v2628_v57, %v2636_v30  ;;  %v3758_v57 = vld [vmem:[%s5660_s4 + $0xd0] sm:$0xff] }
 0x29d   : > { %3752 = vmatmul.mubr.msk.f32.gmra.mrb[4].mxu1 %vm1764_vm12, %v3744_v54  ;;  %v2652_v51 = vmul.f32 %v2644_v43, %v4538_v59  ;;  %v2651_v4 = vmul.f32 %v2640_v49, %v4583_v26  ;;  %v3757_v59 = vld [vmem:[%s5660_s4 + $0xc8] sm:$0xff] }
 0x29e   : > { %2392 = vmatprep.mubr.f32.mxu1 %v4192_v0 }
 0x29f   : > { %v5095_v12 = vpop.permute.xlu1 %2823  ;;  %v5097_v37 = vpop.permute.xlu0 %2817  ;;  %v3939_v33 = vpack.c.bf16 %v2652_v51, %v2650_v62  ;;  %v3941_v18 = vpack.c.bf16 %v2651_v4, %v2649_v9  ;;  %v3760_v51 = vld [vmem:[%s5660_s4 + $0xe0] sm:$0xff]  ;;  %v3762_v4 = vld [vmem:[%s5660_s4 + $0xf0] sm:$0xff] }
 0x2a0   : > { %v2835_v5 = vsel %vm1221_vm9, %v5095_v12, %v5088_v38 }
 0x2a1   : > { %3753 = vmatmul.mubr.msk.f32.gmra.mrb[6].mxu1 %vm1764_vm12, %v3745_v35  ;;  %v2840_v13 = vmul.f32 %v2835_v5, %v4590_v28 }
 0x2a2   : > { %2398 = vmatprep.mubr.f32.mxu1 %v4192_v0 }
 0x2a3   : > { %v5104_v40 = vpop.permute.xlu1 %2819  ;;  %v5106_v42 = vpop.permute.xlu0 %2825 }
 0x2a4   : > { %v2836_v47 = vsel %vm1221_vm9, %v5106_v42, %v5097_v37 }
 0x2a5   : > { %3754 = vmatmul.mubr.msk.f32.gmra.mrb[8].mxu1 %vm1764_vm12, %v3746_v39  ;;  %v2842_v55 = vmul.f32 %v2836_v47, %v4590_v28 }
 0x2a6   : > { %2404 = vmatprep.mubr.f32.mxu1 %v4192_v0 }
 0x2a7   : > { %v5119_v21 = vpop.permute.xlu1 %2827  ;;  %v5121_v46 = vpop.permute.xlu0 %2821  ;;  %v3943_v24 = vpack.c.bf16 %v2842_v55, %v2840_v13  ;;  %v2832_v55 = vsel %vm1221_vm9, %v5097_v37, %v5106_v42  ;;  %v3763_v42 = vld [vmem:[%s5660_s4 + $0xf8] sm:$0xff] }
 0x2a9   : > { %3755 = vmatmul.mubr.msk.f32.gmra.mrb[10].mxu1 %vm1764_vm12, %v3747_v44 }
 0x2aa   : > { %2556 = vmatprep.mubr.f32.mxu1 %v4192_v0 }
 0x2ab   : > { %v1725_v63 = vpop.permute.xlu1 %1724  ;;  %v5142_v2 = vpop.permute.xlu0 %2829 }
 0x2ac   : > { %v2838_v37 = vsel %vm1221_vm9, %v5142_v2, %v5121_v46 }
 0x2ad   : > { %3764 = vmatmul.mubr.msk.f32.vlgmr.msra.gmra.mrb[12].mxu1 %vm1764_vm12, %v3756_v60  ;;  %v3761_v60 = vld [vmem:[%s5660_s4 + $0xe8] sm:$0xff] }
 0x2ae   : > { %3938 = vmatpush1.bf16.msra.mxu1 %v3937_v3  ;;  %2562 = vmatprep.mubr.f32.mxu1 %v4192_v0 }
 0x2af   : > { %3940 = vmatprep.subr.bf16.mxu1 %v3939_v33  ;;  %v1733_v15 = vpop.permute.xlu1 %1732  ;;  %v1727_v17 = vpop.permute.xlu0 %1726 }
 0x2b0   : > { %v1740_v29 = vsel %vm344_vm0, %v1725_v63, %v1733_v15  ;;  %v1744_v26 = vsel %vm344_vm0, %v1733_v15, %v1725_v63 }
 0x2b1   : > { %3765 = vmatmul.mubr.msk.f32.gmra.mrb[14].mxu1 %vm1764_vm12, %v3757_v59  ;;  %v1748_v35 = vmul.f32 %v1744_v26, %v4357_v19  ;;  %v1749_v39 = vmul.f32 %v1740_v29, %v4360_v20  ;;  %v2841_v29 = vmul.f32 %v2832_v55, %v4629_v50  ;;  %v2837_v26 = vsel %vm1221_vm9, %v5119_v21, %v5104_v40  ;;  %v3778_v55 = vld [vmem:[%s5660_s4 + $0x170] sm:$0xff] }
 0x2b2   : > { %3942 = vmatpush1.bf16.msra.mxu1 %v3941_v18  ;;  %2568 = vmatprep.mubr.f32.mxu1 %v4192_v0 }
 0x2b3   : > { %3944 = vmatprep.subr.bf16.mxu1 %v3943_v24  ;;  %v1735_v25 = vpop.permute.xlu0 %1734  ;;  %v1729_v11 = vpop.permute.xlu1 %1728 }
 0x2b4   : > { %v1741_v54 = vsel %vm344_vm0, %v1727_v17, %v1735_v25  ;;  %v1745_v30 = vsel %vm344_vm0, %v1735_v25, %v1727_v17  ;;  %v2846_v25 = vmul.f32 %v2838_v37, %v4590_v28 }
 0x2b5   : > { %v1750_v43 = vmul.f32 %v1745_v30, %v4357_v19  ;;  %v1751_v44 = vmul.f32 %v1741_v54, %v4360_v20  ;;  %3766 = vmatmul.mubr.msk.f32.gmra.mrb[0].mxu1 %vm1764_vm12, %v3758_v57  ;;  %v2834_v57 = vsel %vm1221_vm9, %v5121_v46, %v5142_v2  ;;  %v1756_v2 = vld [vmem:[%s5660_s4] sm:$0xff]  ;;  %v2844_v30 = vmul.f32 %v2837_v26, %v4590_v28 }
 0x2b6   : > { %2574 = vmatprep.mubr.f32.mxu1 %v4192_v0 }
 0x2b7   : > { %v3897_v48 = vpack.c.bf16 %v1750_v43, %v1748_v35  ;;  %v1731_v32 = vpop.permute.xlu0 %1730  ;;  %v3895_v49 = vpack.c.bf16 %v1751_v44, %v1749_v39  ;;  %v1737_v58 = vpop.permute.xlu1 %1736  ;;  %v2845_v39 = vmul.f32 %v2834_v57, %v4629_v50  ;;  %v3907_v43 = vpack.c.bf16 %v4805_v36, %v4797_v31 }
 0x2b8   : > { %v1742_v63 = vsel %vm344_vm0, %v1729_v11, %v1737_v58  ;;  %v1746_v3 = vsel %vm344_vm0, %v1737_v58, %v1729_v11  ;;  %v3905_v11 = vpack.c.bf16 %v4783_v7, %v4777_v1  ;;  %v1757_v1 = vld [vmem:[%s5660_s4 + $0x8] sm:$0xff] }
 0x2b9   : > { %3896 = vmatprep.subr.bf16.mxu0 %v3895_v49  ;;  %3767 = vmatmul.mubr.msk.f32.gmra.mrb[2].mxu1 %vm1764_vm12, %v3759_v45  ;;  %v1752_v59 = vmul.f32 %v1746_v3, %v4357_v19  ;;  %v1753_v13 = vmul.f32 %v1742_v63, %v4360_v20  ;;  %v3773_v7 = vld [vmem:[%s5660_s4 + $0x148] sm:$0xff]  ;;  %v1760_v49 = vld [vmem:[%s5660_s4 + $0x20] sm:$0xff] }
 0x2ba   : > { %3898 = vmatpush1.bf16.msra.mxu0 %v3897_v48  ;;  %2580 = vmatprep.mubr.f32.mxu1 %v4192_v0  ;;  %v3774_v48 = vld [vmem:[%s5660_s4 + $0x150] sm:$0xff]  ;;  %v1761_v63 = vld [vmem:[%s5660_s4 + $0x28] sm:$0xff] }
 0x2bb   : > { %v5184_v47 = vpop.permute.xlu0 %3011  ;;  %v5193_v62 = vpop.permute.xlu1 %3009  ;;  %v3777_v3 = vld [vmem:[%s5660_s4 + $0x168] sm:$0xff] }
 0x2bd   : > { %3768 = vmatmul.mubr.msk.f32.gmra.mrb[4].mxu1 %vm1764_vm12, %v3760_v51  ;;  %v3776_v51 = vld [vmem:[%s5660_s4 + $0x160] sm:$0xff] }
 0x2be   : > { %2586 = vmatprep.mubr.f32.mxu1 %v4192_v0 }
 0x2bf   : > { %v5191_v61 = vpop.permute.xlu0 %3019  ;;  %v5229_v18 = vpop.permute.xlu1 %3017 }
 0x2c0   : > { %v3029_v54 = vsel %vm1377_vm10, %v5229_v18, %v5193_v62  ;;  %v3030_v46 = vsel %vm1377_vm10, %v5191_v61, %v5184_v47 }
 0x2c1   : > { %3769 = vmatmul.mubr.msk.f32.gmra.mrb[6].mxu1 %vm1764_vm12, %v3761_v60  ;;  %v3034_v44 = vmul.f32 %v3029_v54, %v4636_v53  ;;  %v3036_v45 = vmul.f32 %v3030_v46, %v4636_v53 }
 0x2c2   : > { %2592 = vmatprep.mubr.f32.mxu1 %v4192_v0 }
 0x2c3   : > { %v1739_v5 = vpop.permute.xlu0 %1738  ;;  %v3951_v36 = vpack.c.bf16 %v3036_v45, %v3034_v44  ;;  %v3705_v44 = vld [vmem:[%s5660_s4 + $0x128] sm:$0xff] }
 0x2c4   : > { %v1743_v33 = vsel %vm344_vm0, %v1731_v32, %v1739_v5  ;;  %v1747_v9 = vsel %vm344_vm0, %v1739_v5, %v1731_v32  ;;  %v3014_v32 = vpop.permute.xlu1 %3013  ;;  %v1762_v5 = vld [vmem:[%s5660_s4 + $0x30] sm:$0xff]  ;;  %v3793_v45 = vld [vmem:[%s5660_s4 + $0x1a8] sm:$0xff] }
 0x2c5   : > { %v1754_v15 = vmul.f32 %v1747_v9, %v4357_v19  ;;  %v1755_v17 = vmul.f32 %v1743_v33, %v4360_v20  ;;  %3770 = vmatmul.mubr.msk.f32.gmra.mrb[8].mxu1 %vm1764_vm12, %v3762_v4  ;;  %v2831_v19 = vsel %vm1221_vm9, %v5088_v38, %v5095_v12  ;;  %v3903_v38 = vpack.c.bf16 %v4789_v22, %v4781_v6  ;;  %v3772_v6 = vld [vmem:[%s5660_s4 + $0x140] sm:$0xff] }
 0x2c6   : > { %2598 = vmatprep.mubr.f32.mxu1 %v4192_v0  ;;  %v2839_v12 = vmul.f32 %v2831_v19, %v4629_v50  ;;  %v2833_v22 = vsel %vm1221_vm9, %v5104_v40, %v5119_v21  ;;  %v3947_v40 = vpack.c.bf16 %v2846_v25, %v2844_v30  ;;  %v1758_v21 = vld [vmem:[%s5660_s4 + $0x10] sm:$0xff]  ;;  %v3025_v9 = vsel %vm1377_vm10, %v5193_v62, %v5229_v18  ;;  %v1763_v62 = vld [vmem:[%s5660_s4 + $0x38] sm:$0xff] }
 0x2c7   : > { %v3901_v20 = vpack.c.bf16 %v1754_v15, %v1752_v59  ;;  %v3899_v24 = vpack.c.bf16 %v1755_v17, %v1753_v13  ;;  %v2843_v28 = vmul.f32 %v2833_v22, %v4629_v50  ;;  %v3909_v50 = vpack.c.bf16 %v4799_v34, %v4791_v16  ;;  %v3016_v16 = vpop.permute.xlu0 %3015  ;;  %v1759_v34 = vld [vmem:[%s5660_s4 + $0x18] sm:$0xff] }
 0x2c8   : > { %v3945_v35 = vpack.c.bf16 %v2841_v29, %v2839_v12  ;;  %v3022_v60 = vpop.permute.xlu1 %3021  ;;  %v3026_v59 = vsel %vm1377_vm10, %v5184_v47, %v5191_v61  ;;  %v3779_v15 = vld [vmem:[%s5660_s4 + $0x178] sm:$0xff]  ;;  %v3033_v61 = vmul.f32 %v3025_v9, %v4676_v8  ;;  %v3788_v29 = vld [vmem:[%s5660_s4 + $0x180] sm:$0xff] }
 0x2c9   : > { %3900 = vmatprep.subr.bf16.mxu0 %v3899_v24  ;;  %3771 = vmatmul.mubr.msk.f32.gmra.mrb[10].mxu1 %vm1764_vm12, %v3763_v42  ;;  %v3949_v31 = vpack.c.bf16 %v2845_v39, %v2843_v28  ;;  %v3035_v17 = vmul.f32 %v3026_v59, %v4676_v8  ;;  %v3031_v37 = vsel %vm1377_vm10, %v3022_v60, %v3014_v32  ;;  %v3700_v24 = vld [vmem:[%s5660_s4 + $0x100] sm:$0xff]  ;;  %v3706_v28 = vld [vmem:[%s5660_s4 + $0x130] sm:$0xff]  ;;  %v3807_v59 = vld [vmem:[%s5660_s4 + $0x1d8] sm:$0xff] }
 0x2ca   : > { %3902 = vmatpush1.bf16.msra.mxu0 %v3901_v20  ;;  %2750 = vmatprep.mubr.f32.mxu1 %v4192_v0  ;;  %v3027_v26 = vsel %vm1377_vm10, %v3014_v32, %v3022_v60  ;;  %v3038_v57 = vmul.f32 %v3031_v37, %v4636_v53  ;;  %v3704_v39 = vld [vmem:[%s5660_s4 + $0x120] sm:$0xff]  ;;  %v3822_v37 = vld [vmem:[%s5660_s4 + $0x210] sm:$0xff] }
 0x2cb   : > { %3904 = vmatprep.subr.bf16.mxu0 %v3903_v38  ;;  %v3024_v58 = vpop.permute.xlu0 %3023  ;;  %v3953_v25 = vpack.c.bf16 %v3035_v17, %v3033_v61  ;;  %v3804_v60 = vld [vmem:[%s5660_s4 + $0x1c0] sm:$0xff]  ;;  %v3821_v17 = vld [vmem:[%s5660_s4 + $0x208] sm:$0xff] }
 0x2cc   : > { %v5338_v33 = vpop.permute.xlu1 %3203  ;;  %v3032_v13 = vsel %vm1377_vm10, %v3024_v58, %v3016_v16  ;;  %v3028_v42 = vsel %vm1377_vm10, %v3016_v16, %v3024_v58  ;;  %v3724_v58 = vld [vmem:[%s5660_s4 + $0x40] sm:$0xff] }
 0x2cd   : > { %3708 = vmatmul.mubr.msk.f32.vlgmr.msra.gmra.mrb[8].mxu0 %vm1764_vm12, %v1756_v2  ;;  %3780 = vmatmul.mubr.msk.f32.vlgmr.msra.gmra.mrb[12].mxu1 %vm1764_vm12, %v3772_v6  ;;  %v3040_v19 = vmul.f32 %v3032_v13, %v4636_v53  ;;  %v3039_v38 = vmul.f32 %v3028_v42, %v4676_v8  ;;  %v3037_v2 = vmul.f32 %v3027_v26, %v4676_v8  ;;  %v3701_v53 = vld [vmem:[%s5660_s4 + $0x108] sm:$0xff]  ;;  %v3808_v13 = vld [vmem:[%s5660_s4 + $0x1e0] sm:$0xff]  ;;  %v3823_v42 = vld [vmem:[%s5660_s4 + $0x218] sm:$0xff] }
 0x2ce   : > { %3946 = vmatpush1.bf16.msra.mxu1 %v3945_v35  ;;  %3906 = vmatpush1.bf16.msra.mxu0 %v3905_v11  ;;  %v3789_v6 = vld [vmem:[%s5660_s4 + $0x188] sm:$0xff]  ;;  %v3791_v35 = vld [vmem:[%s5660_s4 + $0x198] sm:$0xff]  ;;  %v3792_v11 = vld [vmem:[%s5660_s4 + $0x1a0] sm:$0xff] }
 0x2cf   : > { %3948 = vmatprep.subr.bf16.mxu1 %v3947_v40  ;;  %3908 = vmatprep.subr.bf16.mxu0 %v3907_v43  ;;  %v5326_v4 = vpop.permute.xlu0 %3205  ;;  %v3955_v46 = vpack.c.bf16 %v3040_v19, %v3038_v57  ;;  %v3957_v30 = vpack.c.bf16 %v3039_v38, %v3037_v2  ;;  %v3820_v61 = vld [vmem:[%s5660_s4 + $0x200] sm:$0xff] }
 0x2d0   : > { %1859 = vmatprep.mubr.f32.mxu0 %v4192_v0  ;;  %2756 = vmatprep.mubr.f32.mxu1 %v4192_v0  ;;  %v5369_v18 = vpop.permute.xlu1 %3211  ;;  %v3824_v19 = vld [vmem:[%s5660_s4 + $0x220] sm:$0xff] }
 0x2d1   : > { %3709 = vmatmul.mubr.msk.f32.gmra.mrb[10].mxu0 %vm1764_vm12, %v1757_v1  ;;  %3781 = vmatmul.mubr.msk.f32.gmra.mrb[14].mxu1 %vm1764_vm12, %v3773_v7  ;;  %v3223_v12 = vsel %vm1532_vm11, %v5369_v18, %v5338_v33  ;;  %v3794_v1 = vld [vmem:[%s5660_s4 + $0x1b0] sm:$0xff]  ;;  %v3219_v16 = vsel %vm1532_vm11, %v5338_v33, %v5369_v18  ;;  %v3825_v18 = vld [vmem:[%s5660_s4 + $0x228] sm:$0xff] }
 0x2d2   : > { %3950 = vmatpush1.bf16.msra.mxu1 %v3949_v31  ;;  %3910 = vmatpush1.bf16.msra.mxu0 %v3909_v50  ;;  %v3228_v22 = vmul.f32 %v3223_v12, %v4683_v23 }
 0x2d3   : > { %3952 = vmatprep.subr.bf16.mxu1 %v3951_v36  ;;  %3912 = vmatprep.subr.bf16.mxu0 %v4934_v52  ;;  %v3775_v52 = vld [vmem:[%s5660_s4 + $0x158] sm:$0xff]  ;;  %v5360_v47 = vpop.permute.xlu0 %3213 }
 0x2d4   : > { %1865 = vmatprep.mubr.f32.mxu0 %v4192_v0  ;;  %2762 = vmatprep.mubr.f32.mxu1 %v4192_v0  ;;  %v3224_v20 = vsel %vm1532_vm11, %v5360_v47, %v5326_v4  ;;  %v3208_v40 = vpop.permute.xlu1 %3207  ;;  %v3220_v31 = vsel %vm1532_vm11, %v5326_v4, %v5360_v47  ;;  %v3811_v47 = vld [vmem:[%s5660_s4 + $0x1f8] sm:$0xff] }
 0x2d5   : > { %3710 = vmatmul.mubr.msk.f32.gmra.mrb[12].mxu0 %vm1764_vm12, %v1758_v21  ;;  %3782 = vmatmul.mubr.msk.f32.gmra.mrb[0].mxu1 %vm1764_vm12, %v3774_v48  ;;  %v3230_v54 = vmul.f32 %v3224_v20, %v4683_v23  ;;  %v3707_v21 = vld [vmem:[%s5660_s4 + $0x138] sm:$0xff]  ;;  %v3826_v20 = vld [vmem:[%s5660_s4 + $0x230] sm:$0xff] }
 0x2d6   : > { %1871 = vmatprep.mubr.f32.mxu0 %v4192_v0  ;;  %2768 = vmatprep.mubr.f32.mxu1 %v4192_v0  ;;  %v3795_v48 = vld [vmem:[%s5660_s4 + $0x1b8] sm:$0xff] }
 0x2d7   : > { %v3959_v8 = vpack.c.bf16 %v3230_v54, %v3228_v22  ;;  %v3210_v43 = vpop.permute.xlu0 %3209 }
 0x2d8   : > { %v3216_v50 = vpop.permute.xlu1 %3215 }
 0x2d9   : > { %3711 = vmatmul.mubr.msk.f32.gmra.mrb[14].mxu0 %vm1764_vm12, %v1759_v34  ;;  %3783 = vmatmul.mubr.msk.f32.gmra.mrb[2].mxu1 %vm1764_vm12, %v3775_v52  ;;  %v3229_v34 = vmul.f32 %v3220_v31, %v4720_v41  ;;  %v3225_v52 = vsel %vm1532_vm11, %v3216_v50, %v3208_v40 }
 0x2da   : > { %1877 = vmatprep.mubr.f32.mxu0 %v4192_v0  ;;  %2774 = vmatprep.mubr.f32.mxu1 %v4192_v0 }
 0x2dc   : > { %v3218_v7 = vpop.permute.xlu0 %3217 }
 0x2dd   : > { %3712 = vmatmul.mubr.msk.f32.gmra.mrb[16].mxu0 %vm1764_vm12, %v1760_v49  ;;  %3784 = vmatmul.mubr.msk.f32.gmra.mrb[4].mxu1 %vm1764_vm12, %v3776_v51  ;;  %v3226_v36 = vsel %vm1532_vm11, %v3218_v7, %v3210_v43  ;;  %v3222_v32 = vsel %vm1532_vm11, %v3210_v43, %v3218_v7  ;;  %v3227_v51 = vmul.f32 %v3219_v16, %v4720_v41 }
 0x2de   : > { %1883 = vmatprep.mubr.f32.mxu0 %v4192_v0  ;;  %2780 = vmatprep.mubr.f32.mxu1 %v4192_v0  ;;  %v3234_v49 = vmul.f32 %v3226_v36, %v4683_v23 }
 0x2df   : > { %v3961_v4 = vpack.c.bf16 %v3229_v34, %v3227_v51 }
 0x2e1   : > { %3713 = vmatmul.mubr.msk.f32.gmra.mrb[18].mxu0 %vm1764_vm12, %v1761_v63  ;;  %3785 = vmatmul.mubr.msk.f32.gmra.mrb[6].mxu1 %vm1764_vm12, %v3777_v3  ;;  %v3221_v63 = vsel %vm1532_vm11, %v3208_v40, %v3216_v50  ;;  %v3232_v3 = vmul.f32 %v3225_v52, %v4683_v23  ;;  %v3805_v23 = vld [vmem:[%s5660_s4 + $0x1c8] sm:$0xff]  ;;  %v3456_v52 = vld [vmem:[%s5605_s29 + $0x18] sm:$0xff] }
 0x2e2   : > { %1889 = vmatprep.mubr.f32.mxu0 %v4192_v0  ;;  %2786 = vmatprep.mubr.f32.mxu1 %v4192_v0  ;;  %v3231_v33 = vmul.f32 %v3221_v63, %v4720_v41 }
 0x2e5   : > { %3714 = vmatmul.mubr.msk.f32.gmra.mrb[20].mxu0 %vm1764_vm12, %v1762_v5  ;;  %3786 = vmatmul.mubr.msk.f32.gmra.mrb[8].mxu1 %vm1764_vm12, %v3778_v55  ;;  %v3233_v5 = vmul.f32 %v3222_v32, %v4720_v41  ;;  %v3963_v55 = vpack.c.bf16 %v3234_v49, %v3232_v3  ;;  %v3806_v41 = vld [vmem:[%s5660_s4 + $0x1d0] sm:$0xff] }
 0x2e6   : > { %1895 = vmatprep.mubr.f32.mxu0 %v4192_v0  ;;  %2792 = vmatprep.mubr.f32.mxu1 %v4192_v0 }
 0x2e7   : > { %v3965_v9 = vpack.c.bf16 %v3233_v5, %v3231_v33  ;;  %v3457_v33 = vld [vmem:[%s5605_s29 + $0x20] sm:$0xff] }
 0x2e9   : > { %3715 = vmatmul.mubr.msk.f32.gmra.mrb[22].mxu0 %vm1764_vm12, %v1763_v62  ;;  %3787 = vmatmul.mubr.msk.f32.gmra.mrb[10].mxu1 %vm1764_vm12, %v3779_v15  ;;  %v3809_v62 = vld [vmem:[%s5660_s4 + $0x1e8] sm:$0xff]  ;;  %v3810_v15 = vld [vmem:[%s5660_s4 + $0x1f0] sm:$0xff] }
 0x2ea   : > { %1990 = vmatprep.mubr.f32.mxu0 %v4192_v0  ;;  %2944 = vmatprep.mubr.f32.mxu1 %v4192_v0 }
 0x2ed   : > { %3716 = vmatmul.mubr.msk.f32.vlgmr.msra.gmra.mrb[8].mxu0 %vm1764_vm12, %v3700_v24  ;;  %3796 = vmatmul.mubr.msk.f32.vlgmr.msra.gmra.mrb[12].mxu1 %vm1764_vm12, %v3788_v29  ;;  %v3827_v24 = vld [vmem:[%s5660_s4 + $0x238] sm:$0xff]  ;;  %v3405_v50 = vpop.permute.xlu0 %3404 }
 0x2ee   : > { %3914 = vmatpush1.bf16.msra.mxu0 %v4936_v56  ;;  %3954 = vmatpush1.bf16.msra.mxu1 %v3953_v25  ;;  %v3702_v56 = vld [vmem:[%s5660_s4 + $0x110] sm:$0xff] }
 0x2ef   : > { %3916 = vmatprep.subr.bf16.mxu0 %v4966_v10  ;;  %3956 = vmatprep.subr.bf16.mxu1 %v3955_v46  ;;  %v3790_v10 = vld [vmem:[%s5660_s4 + $0x190] sm:$0xff] }
 0x2f0   : > { %2950 = vmatprep.mubr.f32.mxu1 %v4192_v0  ;;  %1996 = vmatprep.mubr.f32.mxu0 %v4192_v0 }
 0x2f1   : > { %3717 = vmatmul.mubr.msk.f32.gmra.mrb[10].mxu0 %vm1764_vm12, %v3701_v53  ;;  %3797 = vmatmul.mubr.msk.f32.gmra.mrb[14].mxu1 %vm1764_vm12, %v3789_v6 }
 0x2f2   : > { %3918 = vmatpush1.bf16.msra.mxu0 %v4968_v27  ;;  %3958 = vmatpush1.bf16.msra.mxu1 %v3957_v30  ;;  %v3703_v27 = vld [vmem:[%s5660_s4 + $0x118] sm:$0xff] }
 0x2f3   : > { %3960 = vmatprep.subr.bf16.mxu1 %v3959_v8  ;;  %2956 = vmatprep.mubr.f32.mxu1 %v4192_v0 }
 0x2f4   : > { %2002 = vmatprep.mubr.f32.mxu0 %v4192_v0 }
 0x2f5   : > { %3718 = vmatmul.mubr.msk.f32.gmra.mrb[12].mxu0 %vm1764_vm12, %v3702_v56  ;;  %3798 = vmatmul.mubr.msk.f32.gmra.mrb[0].mxu1 %vm1764_vm12, %v3790_v10 }
 0x2f6   : > { %2962 = vmatprep.mubr.f32.mxu1 %v4192_v0  ;;  %2008 = vmatprep.mubr.f32.mxu0 %v4192_v0 }
 0x2f9   : > { %3719 = vmatmul.mubr.msk.f32.gmra.mrb[14].mxu0 %vm1764_vm12, %v3703_v27  ;;  %3799 = vmatmul.mubr.msk.f32.gmra.mrb[2].mxu1 %vm1764_vm12, %v3791_v35 }
 0x2fa   : > { %2014 = vmatprep.mubr.f32.mxu0 %v4192_v0  ;;  %2968 = vmatprep.mubr.f32.mxu1 %v4192_v0 }
 0x2fd   : > { %3720 = vmatmul.mubr.msk.f32.gmra.mrb[16].mxu0 %vm1764_vm12, %v3704_v39  ;;  %3800 = vmatmul.mubr.msk.f32.gmra.mrb[4].mxu1 %vm1764_vm12, %v3792_v11  ;;  %v3400_v39 = vpop.permute.xlu1 %3399  ;;  %v3453_v11 = vld [vmem:[%s5605_s29] sm:$0xff] }
 0x2fe   : > { %2020 = vmatprep.mubr.f32.mxu0 %v4192_v0  ;;  %2974 = vmatprep.mubr.f32.mxu1 %v4192_v0 }
 0x301   : > { %3721 = vmatmul.mubr.msk.f32.gmra.mrb[18].mxu0 %vm1764_vm12, %v3705_v44  ;;  %3801 = vmatmul.mubr.msk.f32.gmra.mrb[6].mxu1 %vm1764_vm12, %v3793_v45  ;;  %v3454_v45 = vld [vmem:[%s5605_s29 + $0x8] sm:$0xff] }
 0x302   : > { %2026 = vmatprep.mubr.f32.mxu0 %v4192_v0  ;;  %2980 = vmatprep.mubr.f32.mxu1 %v4192_v0 }
 0x305   : > { %3722 = vmatmul.mubr.msk.f32.gmra.mrb[20].mxu0 %vm1764_vm12, %v3706_v28  ;;  %3802 = vmatmul.mubr.msk.f32.gmra.mrb[8].mxu1 %vm1764_vm12, %v3794_v1 }
 0x306   : > { %2032 = vmatprep.mubr.f32.mxu0 %v4192_v0  ;;  %2986 = vmatprep.mubr.f32.mxu1 %v4192_v0 }
 0x309   : > { %3723 = vmatmul.mubr.msk.f32.gmra.mrb[22].mxu0 %vm1764_vm12, %v3707_v21  ;;  %3803 = vmatmul.mubr.msk.f32.gmra.mrb[10].mxu1 %vm1764_vm12, %v3795_v48  ;;  %v3455_v21 = vld [vmem:[%s5605_s29 + $0x10] sm:$0xff] }
 0x30a   : > { %2168 = vmatprep.mubr.f32.mxu0 %v4192_v0  ;;  %3138 = vmatprep.mubr.f32.mxu1 %v4192_v0 }
 0x30d   : > { %3732 = vmatmul.mubr.msk.f32.vlgmr.msra.gmra.mrb[8].mxu0 %vm1764_vm12, %v3724_v58  ;;  %3812 = vmatmul.mubr.msk.f32.vlgmr.msra.gmra.mrb[12].mxu1 %vm1764_vm12, %v3804_v60 }
 0x30e   : > { %3962 = vmatpush1.bf16.msra.mxu1 %v3961_v4  ;;  %2174 = vmatprep.mubr.f32.mxu0 %v4192_v0  ;;  %v3410_v4 = vpop.permute.xlu1 %3409 }
 0x30f   : > { %3964 = vmatprep.subr.bf16.mxu1 %v3963_v55  ;;  %3144 = vmatprep.mubr.f32.mxu1 %v4192_v0 }
 0x311   : > { %3733 = vmatmul.mubr.msk.f32.gmra.mrb[10].mxu0 %vm1764_vm12, %v3725_v14  ;;  %3813 = vmatmul.mubr.msk.f32.gmra.mrb[14].mxu1 %vm1764_vm12, %v3805_v23 }
 0x312   : > { %3966 = vmatpush1.bf16.msra.mxu1 %v3965_v9  ;;  %3150 = vmatprep.mubr.f32.mxu1 %v4192_v0 }
 0x315   : > { %3814 = vmatmul.mubr.msk.f32.gmra.mrb[0].mxu1 %vm1764_vm12, %v3806_v41  ;;  %v3458_v41 = vld [vmem:[%s5605_s29 + $0x28] sm:$0xff] }
 0x316   : > { %3156 = vmatprep.mubr.f32.mxu1 %v4192_v0 }
 0x319   : > { %3815 = vmatmul.mubr.msk.f32.gmra.mrb[2].mxu1 %vm1764_vm12, %v3807_v59 }
 0x31a   : > { %3162 = vmatprep.mubr.f32.mxu1 %v4192_v0 }
 0x31d   : > { %3816 = vmatmul.mubr.msk.f32.gmra.mrb[4].mxu1 %vm1764_vm12, %v3808_v13 }
 0x31e   : > { %3168 = vmatprep.mubr.f32.mxu1 %v4192_v0 }
 0x321   : > { %3817 = vmatmul.mubr.msk.f32.gmra.mrb[6].mxu1 %vm1764_vm12, %v3809_v62 }
 0x322   : > { %3174 = vmatprep.mubr.f32.mxu1 %v4192_v0 }
 0x325   : > { %3818 = vmatmul.mubr.msk.f32.gmra.mrb[8].mxu1 %vm1764_vm12, %v3810_v15 }
 0x326   : > { %3180 = vmatprep.mubr.f32.mxu1 %v4192_v0 }
 0x329   : > { %3819 = vmatmul.mubr.msk.f32.gmra.mrb[10].mxu1 %vm1764_vm12, %v3811_v47 }
 0x32a   : > { %3332 = vmatprep.mubr.f32.mxu1 %v4192_v0 }
 0x32d   : > { %3828 = vmatmul.mubr.msk.f32.vlgmr.msra.gmra.mrb[12].mxu1 %vm1764_vm12, %v3820_v61 }
 0x32e   : > { %3338 = vmatprep.mubr.f32.mxu1 %v4192_v0 }
 0x331   : > { %3829 = vmatmul.mubr.msk.f32.gmra.mrb[14].mxu1 %vm1764_vm12, %v3821_v17 }
 0x332   : > { %3344 = vmatprep.mubr.f32.mxu1 %v4192_v0 }
 0x335   : > { %3830 = vmatmul.mubr.msk.f32.gmra.mrb[0].mxu1 %vm1764_vm12, %v3822_v37  ;;  %v3415_v37 = vpop.permute.xlu0 %3414 }
 0x336   : > { %3350 = vmatprep.mubr.f32.mxu1 %v4192_v0 }
 0x339   : > { %3831 = vmatmul.mubr.msk.f32.gmra.mrb[2].mxu1 %vm1764_vm12, %v3823_v42 }
 0x33a   : > { %3356 = vmatprep.mubr.f32.mxu1 %v4192_v0 }
 0x33d   : > { %3832 = vmatmul.mubr.msk.f32.gmra.mrb[4].mxu1 %vm1764_vm12, %v3824_v19 }
 0x33e   : > { %3362 = vmatprep.mubr.f32.mxu1 %v4192_v0 }
 0x341   : > { %3833 = vmatmul.mubr.msk.f32.gmra.mrb[6].mxu1 %vm1764_vm12, %v3825_v18  ;;  %v3459_v18 = vld [vmem:[%s5605_s29 + $0x30] sm:$0xff] }
 0x342   : > { %3368 = vmatprep.mubr.f32.mxu1 %v4192_v0 }
 0x345   : > { %3834 = vmatmul.mubr.msk.f32.gmra.mrb[8].mxu1 %vm1764_vm12, %v3826_v20 }
 0x346   : > { %3374 = vmatprep.mubr.f32.mxu1 %v4192_v0 }
 0x349   : > { %3835 = vmatmul.mubr.msk.f32.gmra.mrb[10].mxu1 %vm1764_vm12, %v3827_v24 }
 0x3c8   : > { %v2004_v29 = vpop.f32.mrb[12].mxu0 }
 0x3c9   : > { %v2006_v26 = vpop.f32.mrb[13].mxu0 }
 0x3cc   : > { %v2010_v57 = vpop.f32.mrb[14].mxu0 }
 0x3cd   : > { %v5583_v25 = vpop.f32.mrb[15].mxu0 }
 0x3d0   : > { %v5585_v38 = vpop.f32.mrb[16].mxu0 }
 0x3d1   : > { %v5587_v12 = vpop.f32.mrb[17].mxu0 }
 0x3d4   : > { %v5589_v54 = vpop.f32.mrb[18].mxu0 }
 0x3d5   : > { %v5591_v46 = vpop.f32.mrb[19].mxu0 }
 0x3d8   : > { %v5593_v0 = vpop.f32.mrb[20].mxu0 }
 0x3d9   : > { %v5595_v2 = vpop.f32.mrb[21].mxu0 }
 0x3dc   : > { %v5597_v53 = vpop.f32.mrb[22].mxu0 }
 0x3dd   : > { %v5599_v6 = vpop.f32.mrb[23].mxu0 }
 0x3e0   : > { %v2170_v22 = vpop.f32.mrb[8].mxu0 }
 0x3e1   : > { %v2172_v30 = vpop.f32.mrb[9].mxu0 }
 0x3e4   : > { %v2176_v8 = vpop.f32.mrb[10].mxu0 }
 0x3e5   : > { %v2178_v56 = vpop.f32.mrb[11].mxu0 }
 0x400   : > { %v3334_v10 = vpop.f32.mrb[12].mxu1 }
 0x401   : > { %v3971_v27 = vadd.f32 %v3334_v10, %v2170_v22  ;;  %v3336_v35 = vpop.f32.mrb[13].mxu1 }
 0x402   : > { %v3972_v43 = vadd.f32 %v3336_v35, %v2172_v30  ;;  %v3420_v35 = vpop.permute.xlu1 %3419 }
 0x403   : > { %v3437_v44 = vadd.f32 %v3971_v27, %v3400_v39 }
 0x404   : > { %v3438_v40 = vadd.f32 %v3972_v43, %v3400_v39  ;;  %v3340_v28 = vpop.f32.mrb[14].mxu1 }
 0x405   : > { %v3469_v1 = vmul.f32 %v3453_v11, %v3437_v44  ;;  %v3973_v7 = vadd.f32 %v3340_v28, %v2176_v8  ;;  %v3342_v31 = vpop.f32.mrb[15].mxu1  ;;  %v3461_v11 = vld [vmem:[%s5605_s29 + $0x40] sm:$0xff] }
 0x406   : > { %v3470_v36 = vmul.f32 %v3454_v45, %v3438_v40  ;;  %v3974_v48 = vadd.f32 %v3342_v31, %v2178_v56 }
 0x407   : > { %v3485_v16 = vadd.f32 %v3469_v1, %v3437_v44  ;;  %v3439_v34 = vadd.f32 %v3973_v7, %v3405_v50 }
 0x408   : > { %v3486_v32 = vadd.f32 %v3470_v36, %v3438_v40  ;;  %v3440_v49 = vadd.f32 %v3974_v48, %v3405_v50  ;;  %v3346_v51 = vpop.f32.mrb[0].mxu1  ;;  %v3462_v40 = vld [vmem:[%s5605_s29 + $0x48] sm:$0xff] }
 0x409   : > { %v3501_v58 = vmax.f32 %v3485_v16, 0.0  ;;  %v3471_v60 = vmul.f32 %v3455_v21, %v3439_v34  ;;  %v3975_v63 = vadd.f32 %v3346_v51, %v2004_v29  ;;  %v3348_v3 = vpop.f32.mrb[1].mxu1  ;;  %v3425_v21 = vpop.permute.xlu0 %3424  ;;  %v3463_v16 = vld [vmem:[%s5605_s29 + $0x50] sm:$0xff] }
 0x40a   : > { %v3502_v5 = vmax.f32 %v3486_v32, 0.0  ;;  %v3472_v55 = vmul.f32 %v3456_v52, %v3440_v49  ;;  %v3976_v14 = vadd.f32 %v3348_v3, %v2006_v26  ;;  %v3460_v26 = vld [vmem:[%s5605_s29 + $0x38] sm:$0xff] }
 0x40b   : > { %3517 = vst [vmem:[%s5614_s16] sm:$0xff] %v3501_v58  ;;  %v3487_v23 = vadd.f32 %v3471_v60, %v3439_v34  ;;  %v3441_v9 = vadd.f32 %v3975_v63, %v3410_v4 }
 0x40c   : > { %3518 = vst [vmem:[%s5614_s16 + $0x8] sm:$0xff] %v3502_v5  ;;  %v3488_v59 = vadd.f32 %v3472_v55, %v3440_v49  ;;  %v3442_v13 = vadd.f32 %v3976_v14, %v3410_v4  ;;  %v3352_v62 = vpop.f32.mrb[2].mxu1  ;;  %v3464_v49 = vld [vmem:[%s5605_s29 + $0x58] sm:$0xff]  ;;  %v3430_v5 = vpop.permute.xlu1 %3429 }
 0x40d   : > { %v3503_v15 = vmax.f32 %v3487_v23, 0.0  ;;  %v3473_v47 = vmul.f32 %v3457_v33, %v3441_v9  ;;  %v3977_v61 = vadd.f32 %v3352_v62, %v2010_v57  ;;  %v3354_v17 = vpop.f32.mrb[3].mxu1  ;;  %v3465_v33 = vld [vmem:[%s5605_s29 + $0x60] sm:$0xff] }
 0x40e   : > { %v3504_v42 = vmax.f32 %v3488_v59, 0.0  ;;  %v3474_v19 = vmul.f32 %v3458_v41, %v3442_v13  ;;  %v3978_v20 = vadd.f32 %v3354_v17, %v5583_v25  ;;  %v3466_v41 = vld [vmem:[%s5605_s29 + $0x68] sm:$0xff]  ;;  %v3435_v17 = vpop.permute.xlu0 %3434 }
 0x40f   : > { %3519 = vst [vmem:[%s5614_s16 + $0x10] sm:$0xff] %v3503_v15  ;;  %v3489_v24 = vadd.f32 %v3473_v47, %v3441_v9  ;;  %v3443_v29 = vadd.f32 %v3977_v61, %v3415_v37 }
 0x410   : > { %3520 = vst [vmem:[%s5614_s16 + $0x18] sm:$0xff] %v3504_v42  ;;  %v3490_v22 = vadd.f32 %v3474_v19, %v3442_v13  ;;  %v3444_v30 = vadd.f32 %v3978_v20, %v3415_v37  ;;  %v3358_v8 = vpop.f32.mrb[4].mxu1  ;;  %v3467_v42 = vld [vmem:[%s5605_s29 + $0x70] sm:$0xff] }
 0x411   : > { %v3505_v57 = vmax.f32 %v3489_v24, 0.0  ;;  %v3475_v56 = vmul.f32 %v3459_v18, %v3443_v29  ;;  %v3979_v10 = vadd.f32 %v3358_v8, %v5585_v38  ;;  %v3360_v27 = vpop.f32.mrb[5].mxu1  ;;  %v3468_v24 = vld [vmem:[%s5605_s29 + $0x78] sm:$0xff] }
 0x412   : > { %v3506_v39 = vmax.f32 %v3490_v22, 0.0  ;;  %v3476_v25 = vmul.f32 %v3460_v26, %v3444_v30  ;;  %v3980_v43 = vadd.f32 %v3360_v27, %v5587_v12 }
 0x413   : > { %3521 = vst [vmem:[%s5614_s16 + $0x20] sm:$0xff] %v3505_v57  ;;  %v3491_v44 = vadd.f32 %v3475_v56, %v3443_v29  ;;  %v3445_v45 = vadd.f32 %v3979_v10, %v3420_v35 }
 0x414   : > { %3522 = vst [vmem:[%s5614_s16 + $0x28] sm:$0xff] %v3506_v39  ;;  %v3492_v28 = vadd.f32 %v3476_v25, %v3444_v30  ;;  %v3446_v1 = vadd.f32 %v3980_v43, %v3420_v35  ;;  %v3364_v7 = vpop.f32.mrb[6].mxu1 }
 0x415   : > { %v3507_v38 = vmax.f32 %v3491_v44, 0.0  ;;  %v3477_v31 = vmul.f32 %v3461_v11, %v3445_v45  ;;  %v3981_v50 = vadd.f32 %v3364_v7, %v5589_v54  ;;  %v3366_v36 = vpop.f32.mrb[7].mxu1 }
 0x416   : > { %v3508_v48 = vmax.f32 %v3492_v28, 0.0  ;;  %v3478_v12 = vmul.f32 %v3462_v40, %v3446_v1  ;;  %v3982_v34 = vadd.f32 %v3366_v36, %v5591_v46 }
 0x417   : > { %3523 = vst [vmem:[%s5614_s16 + $0x30] sm:$0xff] %v3507_v38  ;;  %v3493_v52 = vadd.f32 %v3477_v31, %v3445_v45  ;;  %v3447_v32 = vadd.f32 %v3981_v50, %v3425_v21 }
 0x418   : > { %3524 = vst [vmem:[%s5614_s16 + $0x38] sm:$0xff] %v3508_v48  ;;  %v3494_v51 = vadd.f32 %v3478_v12, %v3446_v1  ;;  %v3448_v58 = vadd.f32 %v3982_v34, %v3425_v21  ;;  %v3370_v60 = vpop.f32.mrb[8].mxu1 }
 0x419   : > { %v3509_v54 = vmax.f32 %v3493_v52, 0.0  ;;  %v3479_v63 = vmul.f32 %v3463_v16, %v3447_v32  ;;  %v3983_v3 = vadd.f32 %v3370_v60, %v5593_v0  ;;  %v3372_v4 = vpop.f32.mrb[9].mxu1 }
 0x41a   : > { %v3510_v55 = vmax.f32 %v3494_v51, 0.0  ;;  %v3480_v46 = vmul.f32 %v3464_v49, %v3448_v58  ;;  %v3984_v14 = vadd.f32 %v3372_v4, %v5595_v2 }
 0x41b   : > { %3525 = vst [vmem:[%s5614_s16 + $0x40] sm:$0xff] %v3509_v54  ;;  %v3495_v23 = vadd.f32 %v3479_v63, %v3447_v32  ;;  %v3449_v9 = vadd.f32 %v3983_v3, %v3430_v5 }
 0x41c   : > { %3526 = vst [vmem:[%s5614_s16 + $0x48] sm:$0xff] %v3510_v55  ;;  %v3496_v59 = vadd.f32 %v3480_v46, %v3448_v58  ;;  %v3450_v13 = vadd.f32 %v3984_v14, %v3430_v5  ;;  %v3376_v62 = vpop.f32.mrb[10].mxu1 }
 0x41d   : > { %v3511_v0 = vmax.f32 %v3495_v23, 0.0  ;;  %v3481_v15 = vmul.f32 %v3465_v33, %v3449_v9  ;;  %v3985_v47 = vadd.f32 %v3376_v62, %v5597_v53  ;;  %v3378_v61 = vpop.f32.mrb[11].mxu1 }
 0x41e   : > { %v3512_v2 = vmax.f32 %v3496_v59, 0.0  ;;  %v3482_v37 = vmul.f32 %v3466_v41, %v3450_v13  ;;  %v3986_v19 = vadd.f32 %v3378_v61, %v5599_v6 }
 0x41f   : > { %3527 = vst [vmem:[%s5614_s16 + $0x50] sm:$0xff] %v3511_v0  ;;  %v3497_v18 = vadd.f32 %v3481_v15, %v3449_v9  ;;  %v3451_v20 = vadd.f32 %v3985_v47, %v3435_v17 }
 0x420   : > { %3528 = vst [vmem:[%s5614_s16 + $0x58] sm:$0xff] %v3512_v2  ;;  %v3498_v29 = vadd.f32 %v3482_v37, %v3450_v13  ;;  %v3452_v26 = vadd.f32 %v3986_v19, %v3435_v17 }
 0x421   : > { %v3513_v22 = vmax.f32 %v3497_v18, 0.0  ;;  %v3483_v53 = vmul.f32 %v3467_v42, %v3451_v20 }
 0x422   : > { %v3514_v30 = vmax.f32 %v3498_v29, 0.0  ;;  %v3484_v8 = vmul.f32 %v3468_v24, %v3452_v26 }
 0x423   : > { %3529 = vst [vmem:[%s5614_s16 + $0x60] sm:$0xff] %v3513_v22  ;;  %v3499_v57 = vadd.f32 %v3483_v53, %v3451_v20 }
 0x424   : > { %3530 = vst [vmem:[%s5614_s16 + $0x68] sm:$0xff] %v3514_v30  ;;  %v3500_v56 = vadd.f32 %v3484_v8, %v3452_v26 }
 0x425   : > { %v3515_v10 = vmax.f32 %v3499_v57, 0.0 }
 0x426   : > { %v3516_v27 = vmax.f32 %v3500_v56, 0.0 }
 0x427   : > { %3531 = vst [vmem:[%s5614_s16 + $0x70] sm:$0xff] %v3515_v10 }
 0x428   : > { %3532 = vst [vmem:[%s5614_s16 + $0x78] sm:$0xff] %v3516_v27 }
 0x429 PF: > { %s17_s24 = sadd.s32 1, %s4190_s24  }
 0x42a   : > { %p14_p4 = scmp.ge.s32.totalorder %s17_s24, 4  }
 0x42c   :  { %16 = sbr.rel (!%p14_p4) target bundleno = 1 (0x1), region = 97 }

</bundles_post_ra>
